<compile_context>
chip_gen: v7x
topology: tpu7x:2x2x1
jax: 0.10.0
libtpu: 0.0.40
codegen_flags: <defaults>
</compile_context>

<pallas_src>
import functools
import math

import jax
import jax.numpy as jnp
from jax.experimental import pallas as pl
from jax.experimental.pallas import tpu as pltpu


def _layernorm(x, alpha, bias, eps=1e-6):
    # torch Norm: unbiased std (N-1), eps added to std. Exact reciprocal here:
    # approx-recip error would feed straight into the residual stream.
    d = x.shape[-1]
    mean = jnp.mean(x, axis=-1, keepdims=True)
    c = x - mean
    var = jnp.sum(c * c, axis=-1, keepdims=True) / (d - 1)
    return alpha * c / (jnp.sqrt(var) + eps) + bias


def encoder_layer_kernel(
    xq_ref, x2q_ref, k_ref, v_ref, mask_ref,
    a2_ref, b2n_ref,
    wq_ref, bq_ref, wo_ref, bo_ref,
    w1_ref, bf1_ref, w2_ref, bf2_ref,
    o_ref,
    q_s, m_s, l_s, acc_s, pack_s,
    *, heads: int,
):
    kv = pl.program_id(2)
    nkv = pl.num_programs(2)
    D = xq_ref.shape[-1]
    d_k = D // heads
    scale = 1.0 / math.sqrt(d_k)
    bf16 = jnp.bfloat16

    # ---- init (once per (batch, query tile)): head-grouped Q projection ----
    @pl.when(kv == 0)
    def _init():
        m_s[...] = jnp.full(m_s.shape, -jnp.inf, jnp.float32)
        l_s[...] = jnp.zeros(l_s.shape, jnp.float32)
        acc_s[...] = jnp.zeros(acc_s.shape, jnp.float32)
        # Single [TQ, D] @ [D, D] MXU matmul (full MXU fill), then split per head.
        q_all = jnp.dot(x2q_ref[...], wq_ref[...],
                        preferred_element_type=jnp.float32)
        q_all = ((q_all + bq_ref[...]) * scale).astype(bf16)
        for h in range(heads):                       # init-only static loop
            q_s[h] = q_all[:, h * d_k:(h + 1) * d_k]

    # ---- one K/V tile: per-head flash (online softmax) update ----
    # Additive mask bias computed once per kv step, shared by all heads.
    mask_bias = jnp.where(mask_ref[...] == 0.0, -1e9, 0.0).astype(jnp.float32)

    def head_body(h, carry):
        kh = k_ref[h]                                # [TK, d_k] bf16
        vh = v_ref[h]                                # [TK, d_k] bf16
        s = jax.lax.dot_general(                     # [TQ, TK]; q carries 1/sqrt(dk)
            q_s[h], kh, dimension_numbers=(((1,), (1,)), ((), ())),
            preferred_element_type=jnp.float32)
        s = s + mask_bias
        m_prev = m_s[h]
        m_new = jnp.maximum(m_prev, jnp.max(s, axis=-1, keepdims=True))
        alpha = jnp.exp(m_prev - m_new)
        p = jnp.exp(s - m_new)
        l_s[h] = alpha * l_s[h] + jnp.sum(p, axis=-1, keepdims=True)
        acc_s[h] = alpha * acc_s[h] + jnp.dot(
            p.astype(bf16), vh, preferred_element_type=jnp.float32)
        m_s[h] = m_new
        # TODO(synk): attention-weight dropout skipped (eval-mode identity).
        return carry

    jax.lax.fori_loop(0, heads, head_body, 0)

    # ---- finalize (last K/V tile): WO projection + residual + FFN ----
    @pl.when(kv == nkv - 1)
    def _finalize():
        # Pack normalized head outputs into one lane-dense [TQ, D] bf16 buffer,
        # then a single [TQ, D] @ [D, D] output projection.
        for h in range(heads):                       # finalize-only static loop
            oh = acc_s[h] * pl.reciprocal(l_s[h], approx=True)
            pack_s[:, h * d_k:(h + 1) * d_k] = oh.astype(bf16)
        attn = jnp.dot(pack_s[...], wo_ref[...],
                       preferred_element_type=jnp.float32)
        x = xq_ref[...] + attn + bo_ref[...]         # dropout_1 = identity (eval)

        x2 = _layernorm(x, a2_ref[...], b2n_ref[...])
        # TODO(synk): for d_ff >= 4096 on v7x, tile these two matmuls along d_ff.
        h1 = jnp.dot(x2.astype(bf16), w1_ref[...],
                     preferred_element_type=jnp.float32) + bf1_ref[...]
        h1 = jnp.maximum(h1, 0.0)                    # ReLU; ff dropout = identity
        ff = jnp.dot(h1.astype(bf16), w2_ref[...],
                     preferred_element_type=jnp.float32) + bf2_ref[...]
        o_ref[...] = (x + ff).astype(o_ref.dtype)    # dropout_2 = identity (eval)


def _tpu_vmem_capacity():
    cap = None
    try:
        info = pltpu.get_tpu_info()
        cap = getattr(info, "vmem_capacity_bytes", None)
    except Exception:
        cap = None
    # Conservative default: assume the smallest per-TC VMEM (v7x, 64 MiB).
    return int(cap) if cap else 64 * 1024 * 1024


def _pick_tile(s, vmem_cap):
    # 512-tiles on 128 MiB parts (v5e/v6e), 256-tiles on 64 MiB parts (v7x).
    max_t = 512 if vmem_cap >= 100 * 1024 * 1024 else 256
    for t in (max_t, 256, 128):
        if t <= s and s % t == 0:
            return t
    if s <= max_t:
        return s             # small / odd S: single exact tile
    return max_t             # caller pads S up to a multiple of this


def encoder_layer(x, mask, params, *, heads: int):
    B, S, D = x.shape
    d_k = D // heads
    d_ff = params["w1"].shape[1]
    bf16 = jnp.bfloat16
    f32 = jnp.float32

    vmem_cap = _tpu_vmem_capacity()
    # Leave headroom for Mosaic internal scratch / semaphores / stream buffers.
    vmem_limit = min(vmem_cap - 8 * 1024 * 1024, 112 * 1024 * 1024)

    TQ = TK = _pick_tile(S, vmem_cap)
    S_pad = ((S + TQ - 1) // TQ) * TQ
    if S_pad != S:            # pad sequence; padded keys are masked out below
        x_in = jnp.pad(x, ((0, 0), (0, S_pad - S), (0, 0)))
        mask_in = jnp.pad(mask, ((0, 0), (0, 0), (0, S_pad - S)))
    else:
        x_in, mask_in = x, mask
    nq, nkv = S_pad // TQ, S_pad // TK

    # ---- one-time (per call) XLA precompute: norm_1 + K/V projections ----
    # Removes the nq-fold redundant per-query-tile K/V recompute; these are big
    # head-grouped GEMMs that fill the MXU, and the results are streamed bf16.
    x2 = _layernorm(x_in.astype(f32), params["alpha1"], params["bias1"])
    x2_b = x2.astype(bf16)
    k = jnp.dot(x2_b, params["wk"].astype(bf16),
                preferred_element_type=f32) + params["bk"]
    v = jnp.dot(x2_b, params["wv"].astype(bf16),
                preferred_element_type=f32) + params["bv"]
    k = k.reshape(B, S_pad, heads, d_k).transpose(0, 2, 1, 3).astype(bf16)
    v = v.reshape(B, S_pad, heads, d_k).transpose(0, 2, 1, 3).astype(bf16)

    wq = params["wq"].astype(bf16)
    wo = params["wo"].astype(bf16)
    w1 = params["w1"].astype(bf16)
    w2 = params["w2"].astype(bf16)

    def fixed(shape):         # grid-invariant: fetched once, single-buffered
        nd = len(shape)
        return pl.BlockSpec(shape, lambda b, qi, kv: (0,) * nd,
                            pipeline_mode=pl.Buffered(1))

    in_specs = [
        pl.BlockSpec((None, TQ, D), lambda b, qi, kv: (b, qi, 0)),            # x (residual, f32)
        pl.BlockSpec((None, TQ, D), lambda b, qi, kv: (b, qi, 0)),            # norm_1(x), bf16
        pl.BlockSpec((None, heads, TK, d_k), lambda b, qi, kv: (b, 0, kv, 0)),  # K (bf16)
        pl.BlockSpec((None, heads, TK, d_k), lambda b, qi, kv: (b, 0, kv, 0)),  # V (bf16)
        pl.BlockSpec((None, 1, TK), lambda b, qi, kv: (b, 0, kv)),            # mask (key cols)
        fixed((1, D)), fixed((1, D)),                 # norm_2 alpha, bias
        fixed((D, D)), fixed((1, D)),                 # wq, bq
        fixed((D, D)), fixed((1, D)),                 # wo, bo
        fixed((D, d_ff)), fixed((1, d_ff)),           # w1, b1
        fixed((d_ff, D)), fixed((1, D)),              # w2, b2
    ]

    kernel = functools.partial(encoder_layer_kernel, heads=heads)
    out = pl.pallas_call(
        kernel,
        out_shape=jax.ShapeDtypeStruct((B, S_pad, D), x.dtype),
        grid_spec=pltpu.PrefetchScalarGridSpec(
            num_scalar_prefetch=0,
            grid=(B, nq, nkv),                        # reduction (kv) axis last
            in_specs=in_specs,
            out_specs=pl.BlockSpec((None, TQ, D), lambda b, qi, kv: (b, qi, 0)),
            scratch_shapes=[
                pltpu.VMEM((heads, TQ, d_k), jnp.bfloat16),  # cached scaled Q
                pltpu.VMEM((heads, TQ, 1), jnp.float32),     # running max
                pltpu.VMEM((heads, TQ, 1), jnp.float32),     # running sum
                pltpu.VMEM((heads, TQ, d_k), jnp.float32),   # running PV acc
                pltpu.VMEM((TQ, D), jnp.bfloat16),           # packed head outputs
            ],
        ),
        compiler_params=pltpu.CompilerParams(
            dimension_semantics=("parallel", "parallel", "arbitrary"),
            vmem_limit_bytes=vmem_limit,
        ),
    )(
        x_in, x2_b, k, v, mask_in,
        params["alpha2"], params["bias2"],
        wq, params["bq"], wo, params["bo"],
        w1, params["b1"], w2, params["b2"],
    )
    return out[:, :S, :] if S_pad != S else out


def encoder_layer_ref(x, mask, params, *, heads: int):
    """Pure-JAX f32 reference mirroring the PyTorch forward (eval mode)."""
    def norm(x, alpha, bias, eps=1e-6):
        mean = jnp.mean(x, axis=-1, keepdims=True)
        c = x - mean
        var = jnp.sum(c * c, axis=-1, keepdims=True) / (x.shape[-1] - 1)
        return alpha * c / (jnp.sqrt(var) + eps) + bias

    B, S, D = x.shape
    d_k = D // heads
    x2 = norm(x, params["alpha1"], params["bias1"])
    q = x2 @ params["wq"] + params["bq"]
    k = x2 @ params["wk"] + params["bk"]
    v = x2 @ params["wv"] + params["bv"]
    q = q.reshape(B, S, heads, d_k).transpose(0, 2, 1, 3)
    k = k.reshape(B, S, heads, d_k).transpose(0, 2, 1, 3)
    v = v.reshape(B, S, heads, d_k).transpose(0, 2, 1, 3)
    scores = jnp.einsum("bhqd,bhkd->bhqk", q, k) / math.sqrt(d_k)
    scores = jnp.where(mask[:, None, :, :] == 0.0, -1e9, scores)
    p = jax.nn.softmax(scores, axis=-1)
    attn = jnp.einsum("bhqk,bhkd->bhqd", p, v).transpose(0, 2, 1, 3).reshape(B, S, D)
    attn = attn @ params["wo"] + params["bo"]
    x = x + attn
    x2 = norm(x, params["alpha2"], params["bias2"])
    ff = jnp.maximum(x2 @ params["w1"] + params["b1"], 0.0) @ params["w2"] + params["b2"]
    return x + ff


def init_params(key, d_model, d_ff):
    ks = jax.random.split(key, 8)
    s = 0.1
    return {
        "alpha1": jnp.ones((1, d_model), jnp.float32),
        "bias1": jnp.zeros((1, d_model), jnp.float32),
        "alpha2": jnp.ones((1, d_model), jnp.float32),
        "bias2": jnp.zeros((1, d_model), jnp.float32),
        "wq": s * jax.random.normal(ks[0], (d_model, d_model), jnp.float32),
        "bq": s * jax.random.normal(ks[1], (1, d_model), jnp.float32),
        "wk": s * jax.random.normal(ks[2], (d_model, d_model), jnp.float32),
        "bk": jnp.zeros((1, d_model), jnp.float32),
        "wv": s * jax.random.normal(ks[3], (d_model, d_model), jnp.float32),
        "bv": jnp.zeros((1, d_model), jnp.float32),
        "wo": s * jax.random.normal(ks[4], (d_model, d_model), jnp.float32),
        "bo": jnp.zeros((1, d_model), jnp.float32),
        "w1": s * jax.random.normal(ks[5], (d_model, d_ff), jnp.float32),
        "b1": s * jax.random.normal(ks[6], (1, d_ff), jnp.float32),
        "w2": s * jax.random.normal(ks[7], (d_ff, d_model), jnp.float32),
        "b2": jnp.zeros((1, d_model), jnp.float32),
    }


if __name__ == "__main__":
    B, S, D, HEADS, D_FF = 2, 8, 32, 4, 2048  # d_ff=2048 is the FeedForward default

    key = jax.random.PRNGKey(0)
    kx, kp = jax.random.split(key)
    x = jax.random.normal(kx, (B, S, D), jnp.float32)
    params = init_params(kp, D, D_FF)

    # mask[b, 0, s] == 0 means key position s is masked out; mask last 2 keys of batch 1.
    mask = jnp.ones((B, 1, S), jnp.float32)
    mask = mask.at[1, 0, -2:].set(0.0)

    out = encoder_layer(x, mask, params, heads=HEADS)
    out = jax.block_until_ready(out)

    ref = encoder_layer_ref(x, mask, params, heads=HEADS)
    assert out.shape == (B, S, D)
    # bf16 MXU operands (f32 accumulation) + approx softmax reciprocal -> looser tolerance.
    err = float(jnp.max(jnp.abs(out - ref)))
    assert jnp.allclose(out, ref, atol=5e-2, rtol=5e-2), f"mismatch vs reference (max abs diff {err})"

    print("KERNEL_OK")
</pallas_src>

<mosaic_0001>
module attributes {stable_mosaic.version = 11 : i64} {
  func.func @encoder_layer_kernel(%arg0: i32, %arg1: i32, %arg2: i32, %arg3: memref<1x8x32xf32, #tpu.memory_space<vmem>>, %arg4: memref<1x8x32xbf16, #tpu.memory_space<vmem>>, %arg5: memref<1x4x8x8xbf16, #tpu.memory_space<vmem>>, %arg6: memref<1x4x8x8xbf16, #tpu.memory_space<vmem>>, %arg7: memref<1x1x8xf32, #tpu.memory_space<vmem>>, %arg8: memref<1x32xf32, #tpu.memory_space<vmem>>, %arg9: memref<1x32xf32, #tpu.memory_space<vmem>>, %arg10: memref<32x32xbf16, #tpu.memory_space<vmem>>, %arg11: memref<1x32xf32, #tpu.memory_space<vmem>>, %arg12: memref<32x32xbf16, #tpu.memory_space<vmem>>, %arg13: memref<1x32xf32, #tpu.memory_space<vmem>>, %arg14: memref<32x2048xbf16, #tpu.memory_space<vmem>>, %arg15: memref<1x2048xf32, #tpu.memory_space<vmem>>, %arg16: memref<2048x32xbf16, #tpu.memory_space<vmem>>, %arg17: memref<1x32xf32, #tpu.memory_space<vmem>>, %arg18: memref<1x8x32xf32, #tpu.memory_space<vmem>>, %arg19: memref<4x8x8xbf16, #tpu.memory_space<vmem>>, %arg20: memref<4x8x1xf32, #tpu.memory_space<vmem>>, %arg21: memref<4x8x1xf32, #tpu.memory_space<vmem>>, %arg22: memref<4x8x8xf32, #tpu.memory_space<vmem>>, %arg23: memref<8x32xbf16, #tpu.memory_space<vmem>>) attributes {dimension_semantics = [#tpu.dimension_semantics<parallel>, #tpu.dimension_semantics<parallel>, #tpu.dimension_semantics<arbitrary>], iteration_bounds = array<i64: 2, 1, 1>, scalar_prefetch = 0 : i64, scratch_operands = 5 : i64, tpu.core_type = #tpu.core_type<tc>, window_params = [{transform_indices = @transform_0, window_bounds = array<i64: 1, 8, 32>}, {transform_indices = @transform_1, window_bounds = array<i64: 1, 8, 32>}, {transform_indices = @transform_2, window_bounds = array<i64: 1, 4, 8, 8>}, {transform_indices = @transform_3, window_bounds = array<i64: 1, 4, 8, 8>}, {transform_indices = @transform_4, window_bounds = array<i64: 1, 1, 8>}, {pipeline_mode = #tpu.pipeline_mode<synchronous>, transform_indices = @transform_5, window_bounds = array<i64: 1, 32>}, {pipeline_mode = #tpu.pipeline_mode<synchronous>, transform_indices = @transform_6, window_bounds = array<i64: 1, 32>}, {pipeline_mode = #tpu.pipeline_mode<synchronous>, transform_indices = @transform_7, window_bounds = array<i64: 32, 32>}, {pipeline_mode = #tpu.pipeline_mode<synchronous>, transform_indices = @transform_8, window_bounds = array<i64: 1, 32>}, {pipeline_mode = #tpu.pipeline_mode<synchronous>, transform_indices = @transform_9, window_bounds = array<i64: 32, 32>}, {pipeline_mode = #tpu.pipeline_mode<synchronous>, transform_indices = @transform_10, window_bounds = array<i64: 1, 32>}, {pipeline_mode = #tpu.pipeline_mode<synchronous>, transform_indices = @transform_11, window_bounds = array<i64: 32, 2048>}, {pipeline_mode = #tpu.pipeline_mode<synchronous>, transform_indices = @transform_12, window_bounds = array<i64: 1, 2048>}, {pipeline_mode = #tpu.pipeline_mode<synchronous>, transform_indices = @transform_13, window_bounds = array<i64: 2048, 32>}, {pipeline_mode = #tpu.pipeline_mode<synchronous>, transform_indices = @transform_14, window_bounds = array<i64: 1, 32>}, {transform_indices = @transform_15, window_bounds = array<i64: 1, 8, 32>}]} {
    %c0_i32 = arith.constant 0 : i32
    %0 = arith.cmpi eq, %arg2, %c0_i32 : i32
    %1 = arith.extui %0 : i1 to i32
    %c0_i32_0 = arith.constant 0 : i32
    %2 = arith.cmpi ne, %1, %c0_i32_0 : i32
    scf.if %2 {
      %cst_9 = arith.constant 0xFF800000 : f32
      %14 = vector.broadcast %cst_9 : f32 to vector<4x8x1xf32>
      %c0_10 = arith.constant 0 : index
      %c0_11 = arith.constant 0 : index
      %c0_12 = arith.constant 0 : index
      %15 = vector.load %arg20[%c0_10, %c0_11, %c0_12] : memref<4x8x1xf32, #tpu.memory_space<vmem>>, vector<4x8x1xf32>
      tpu.vector_store %arg20[%c0_10, %c0_11, %c0_12], %14 {strides = array<i32>} : memref<4x8x1xf32, #tpu.memory_space<vmem>>, vector<4x8x1xf32>,
      %cst_13 = arith.constant 0.000000e+00 : f32
      %16 = vector.broadcast %cst_13 : f32 to vector<4x8x1xf32>
      %c0_14 = arith.constant 0 : index
      %c0_15 = arith.constant 0 : index
      %c0_16 = arith.constant 0 : index
      %17 = vector.load %arg21[%c0_14, %c0_15, %c0_16] : memref<4x8x1xf32, #tpu.memory_space<vmem>>, vector<4x8x1xf32>
      tpu.vector_store %arg21[%c0_14, %c0_15, %c0_16], %16 {strides = array<i32>} : memref<4x8x1xf32, #tpu.memory_space<vmem>>, vector<4x8x1xf32>,
      %cst_17 = arith.constant 0.000000e+00 : f32
      %18 = vector.broadcast %cst_17 : f32 to vector<4x8x8xf32>
      %c0_18 = arith.constant 0 : index
      %c0_19 = arith.constant 0 : index
      %c0_20 = arith.constant 0 : index
      %19 = vector.load %arg22[%c0_18, %c0_19, %c0_20] : memref<4x8x8xf32, #tpu.memory_space<vmem>>, vector<4x8x8xf32>
      tpu.vector_store %arg22[%c0_18, %c0_19, %c0_20], %18 {strides = array<i32>} : memref<4x8x8xf32, #tpu.memory_space<vmem>>, vector<4x8x8xf32>,
      %c0_21 = arith.constant 0 : index
      %c0_22 = arith.constant 0 : index
      %c0_23 = arith.constant 0 : index
      %20 = vector.load %arg4[%c0_21, %c0_22, %c0_23] : memref<1x8x32xbf16, #tpu.memory_space<vmem>>, vector<1x8x32xbf16>
      %21 = vector.shape_cast %20 : vector<1x8x32xbf16> to vector<8x32xbf16>
      %c0_24 = arith.constant 0 : index
      %c0_25 = arith.constant 0 : index
      %22 = vector.load %arg10[%c0_24, %c0_25] : memref<32x32xbf16, #tpu.memory_space<vmem>>, vector<32x32xbf16>
      %cst_26 = arith.constant dense<0.000000e+00> : vector<8x32xf32>
      %23 = tpu.matmul %21, %22, %cst_26 {dimension_numbers = #tpu.dot_dimension_numbers<[1], [0], [0], [1], [0, 0, 1, 1], [], []>} : vector<8x32xbf16>, vector<32x32xbf16>, vector<8x32xf32> -> vector<8x32xf32>
      %c0_27 = arith.constant 0 : index
      %c0_28 = arith.constant 0 : index
      %24 = vector.load %arg11[%c0_27, %c0_28] : memref<1x32xf32, #tpu.memory_space<vmem>>, vector<1x32xf32>
      %25 = vector.broadcast %24 : vector<1x32xf32> to vector<8x32xf32>
      %26 = arith.addf %23, %25 : vector<8x32xf32>
      %cst_29 = arith.constant 0.353553385 : f32
      %27 = vector.broadcast %cst_29 : f32 to vector<8x32xf32>
      %28 = arith.mulf %26, %27 : vector<8x32xf32>
      %29 = arith.truncf %28 : vector<8x32xf32> to vector<8x32xbf16>
      %30 = vector.extract_strided_slice %29 {offsets = [0, 0], sizes = [8, 8], strides = [1, 1]} : vector<8x32xbf16> to vector<8x8xbf16>
      %c0_30 = arith.constant 0 : index
      %c0_31 = arith.constant 0 : index
      %c0_32 = arith.constant 0 : index
      %31 = vector.load %arg19[%c0_30, %c0_31, %c0_32] : memref<4x8x8xbf16, #tpu.memory_space<vmem>>, vector<1x8x8xbf16>
      %32 = vector.shape_cast %31 : vector<1x8x8xbf16> to vector<8x8xbf16>
      %33 = vector.shape_cast %30 : vector<8x8xbf16> to vector<1x8x8xbf16>
      tpu.vector_store %arg19[%c0_30, %c0_31, %c0_32], %33 {strides = array<i32>} : memref<4x8x8xbf16, #tpu.memory_space<vmem>>, vector<1x8x8xbf16>,
      %34 = vector.extract_strided_slice %29 {offsets = [0, 8], sizes = [8, 8], strides = [1, 1]} : vector<8x32xbf16> to vector<8x8xbf16>
      %c1 = arith.constant 1 : index
      %c0_33 = arith.constant 0 : index
      %c0_34 = arith.constant 0 : index
      %35 = vector.load %arg19[%c1, %c0_33, %c0_34] : memref<4x8x8xbf16, #tpu.memory_space<vmem>>, vector<1x8x8xbf16>
      %36 = vector.shape_cast %35 : vector<1x8x8xbf16> to vector<8x8xbf16>
      %37 = vector.shape_cast %34 : vector<8x8xbf16> to vector<1x8x8xbf16>
      tpu.vector_store %arg19[%c1, %c0_33, %c0_34], %37 {strides = array<i32>} : memref<4x8x8xbf16, #tpu.memory_space<vmem>>, vector<1x8x8xbf16>,
      %38 = vector.extract_strided_slice %29 {offsets = [0, 16], sizes = [8, 8], strides = [1, 1]} : vector<8x32xbf16> to vector<8x8xbf16>
      %c2 = arith.constant 2 : index
      %c0_35 = arith.constant 0 : index
      %c0_36 = arith.constant 0 : index
      %39 = vector.load %arg19[%c2, %c0_35, %c0_36] : memref<4x8x8xbf16, #tpu.memory_space<vmem>>, vector<1x8x8xbf16>
      %40 = vector.shape_cast %39 : vector<1x8x8xbf16> to vector<8x8xbf16>
      %41 = vector.shape_cast %38 : vector<8x8xbf16> to vector<1x8x8xbf16>
      tpu.vector_store %arg19[%c2, %c0_35, %c0_36], %41 {strides = array<i32>} : memref<4x8x8xbf16, #tpu.memory_space<vmem>>, vector<1x8x8xbf16>,
      %42 = vector.extract_strided_slice %29 {offsets = [0, 24], sizes = [8, 8], strides = [1, 1]} : vector<8x32xbf16> to vector<8x8xbf16>
      %c3 = arith.constant 3 : index
      %c0_37 = arith.constant 0 : index
      %c0_38 = arith.constant 0 : index
      %43 = vector.load %arg19[%c3, %c0_37, %c0_38] : memref<4x8x8xbf16, #tpu.memory_space<vmem>>, vector<1x8x8xbf16>
      %44 = vector.shape_cast %43 : vector<1x8x8xbf16> to vector<8x8xbf16>
      %45 = vector.shape_cast %42 : vector<8x8xbf16> to vector<1x8x8xbf16>
      tpu.vector_store %arg19[%c3, %c0_37, %c0_38], %45 {strides = array<i32>} : memref<4x8x8xbf16, #tpu.memory_space<vmem>>, vector<1x8x8xbf16>,
    } else {
    }
    %c0 = arith.constant 0 : index
    %c0_1 = arith.constant 0 : index
    %c0_2 = arith.constant 0 : index
    %3 = vector.load %arg7[%c0, %c0_1, %c0_2] : memref<1x1x8xf32, #tpu.memory_space<vmem>>, vector<1x1x8xf32>
    %4 = vector.shape_cast %3 : vector<1x1x8xf32> to vector<1x8xf32>
    %cst = arith.constant 0.000000e+00 : f32
    %5 = vector.broadcast %cst : f32 to vector<1x8xf32>
    %6 = arith.cmpf oeq, %4, %5 : vector<1x8xf32>
    %cst_3 = arith.constant -1.000000e+09 : f32
    %cst_4 = arith.constant 0.000000e+00 : f32
    %7 = vector.broadcast %cst_3 : f32 to vector<1x8xf32>
    %8 = vector.broadcast %cst_4 : f32 to vector<1x8xf32>
    %9 = arith.select %6, %7, %8 : vector<1x8xi1>, vector<1x8xf32>
    %c0_i32_5 = arith.constant 0 : i32
    %c4_i32 = arith.constant 4 : i32
    %10 = arith.addi %c0_i32_5, %c4_i32 : i32
    %c1_i32 = arith.constant 1 : i32
    scf.for %arg24 = %c0_i32_5 to %10 step %c1_i32  : i32 {
      %c0_9 = arith.constant 0 : index
      %14 = arith.index_cast %arg24 : i32 to index
      %c0_10 = arith.constant 0 : index
      %c0_11 = arith.constant 0 : index
      %15 = vector.load %arg5[%c0_9, %14, %c0_10, %c0_11] : memref<1x4x8x8xbf16, #tpu.memory_space<vmem>>, vector<1x1x8x8xbf16>
      %16 = vector.shape_cast %15 : vector<1x1x8x8xbf16> to vector<8x8xbf16>
      %c0_12 = arith.constant 0 : index
      %17 = arith.index_cast %arg24 : i32 to index
      %c0_13 = arith.constant 0 : index
      %c0_14 = arith.constant 0 : index
      %18 = vector.load %arg6[%c0_12, %17, %c0_13, %c0_14] : memref<1x4x8x8xbf16, #tpu.memory_space<vmem>>, vector<1x1x8x8xbf16>
      %19 = vector.shape_cast %18 : vector<1x1x8x8xbf16> to vector<8x8xbf16>
      %20 = arith.index_cast %arg24 : i32 to index
      %c0_15 = arith.constant 0 : index
      %c0_16 = arith.constant 0 : index
      %21 = vector.load %arg19[%20, %c0_15, %c0_16] : memref<4x8x8xbf16, #tpu.memory_space<vmem>>, vector<1x8x8xbf16>
      %22 = vector.shape_cast %21 : vector<1x8x8xbf16> to vector<8x8xbf16>
      %cst_17 = arith.constant dense<0.000000e+00> : vector<8x8xf32>
      %23 = tpu.matmul %22, %16, %cst_17 {dimension_numbers = #tpu.dot_dimension_numbers<[1], [1], [0], [0], [0, 0, 1, 0], [], []>} : vector<8x8xbf16>, vector<8x8xbf16>, vector<8x8xf32> -> vector<8x8xf32>
      %24 = vector.broadcast %9 : vector<1x8xf32> to vector<8x8xf32>
      %25 = arith.addf %23, %24 : vector<8x8xf32>
      %26 = arith.index_cast %arg24 : i32 to index
      %c0_18 = arith.constant 0 : index
      %c0_19 = arith.constant 0 : index
      %27 = vector.load %arg20[%26, %c0_18, %c0_19] : memref<4x8x1xf32, #tpu.memory_space<vmem>>, vector<1x8x1xf32>
      %28 = vector.shape_cast %27 : vector<1x8x1xf32> to vector<8x1xf32>
      %cst_20 = arith.constant dense<0xFF800000> : vector<8xf32>
      %29 = vector.multi_reduction <maximumf>, %25, %cst_20 [1] : vector<8x8xf32> to vector<8xf32>
      %30 = vector.shape_cast %29 : vector<8xf32> to vector<8x1xf32>
      %31 = arith.maximumf %28, %30 : vector<8x1xf32>
      %32 = arith.subf %28, %31 : vector<8x1xf32>
      %33 = math.exp %32 : vector<8x1xf32>
      %34 = vector.broadcast %31 : vector<8x1xf32> to vector<8x8xf32>
      %35 = arith.subf %25, %34 : vector<8x8xf32>
      %36 = math.exp %35 : vector<8x8xf32>
      %37 = arith.index_cast %arg24 : i32 to index
      %c0_21 = arith.constant 0 : index
      %c0_22 = arith.constant 0 : index
      %38 = vector.load %arg21[%37, %c0_21, %c0_22] : memref<4x8x1xf32, #tpu.memory_space<vmem>>, vector<1x8x1xf32>
      %39 = vector.shape_cast %38 : vector<1x8x1xf32> to vector<8x1xf32>
      %40 = arith.mulf %33, %39 : vector<8x1xf32>
      %cst_23 = arith.constant dense<0.000000e+00> : vector<8xf32>
      %41 = vector.multi_reduction <add>, %36, %cst_23 [1] : vector<8x8xf32> to vector<8xf32>
      %42 = vector.shape_cast %41 : vector<8xf32> to vector<8x1xf32>
      %43 = arith.addf %40, %42 : vector<8x1xf32>
      %44 = arith.index_cast %arg24 : i32 to index
      %c0_24 = arith.constant 0 : index
      %c0_25 = arith.constant 0 : index
      %45 = vector.load %arg21[%44, %c0_24, %c0_25] : memref<4x8x1xf32, #tpu.memory_space<vmem>>, vector<1x8x1xf32>
      %46 = vector.shape_cast %45 : vector<1x8x1xf32> to vector<8x1xf32>
      %47 = vector.shape_cast %43 : vector<8x1xf32> to vector<1x8x1xf32>
      tpu.vector_store %arg21[%44, %c0_24, %c0_25], %47 {strides = array<i32>} : memref<4x8x1xf32, #tpu.memory_space<vmem>>, vector<1x8x1xf32>,
      %48 = arith.index_cast %arg24 : i32 to index
      %c0_26 = arith.constant 0 : index
      %c0_27 = arith.constant 0 : index
      %49 = vector.load %arg22[%48, %c0_26, %c0_27] : memref<4x8x8xf32, #tpu.memory_space<vmem>>, vector<1x8x8xf32>
      %50 = vector.shape_cast %49 : vector<1x8x8xf32> to vector<8x8xf32>
      %51 = vector.broadcast %33 : vector<8x1xf32> to vector<8x8xf32>
      %52 = arith.mulf %51, %50 : vector<8x8xf32>
      %53 = arith.truncf %36 : vector<8x8xf32> to vector<8x8xbf16>
      %cst_28 = arith.constant dense<0.000000e+00> : vector<8x8xf32>
      %54 = tpu.matmul %53, %19, %cst_28 {dimension_numbers = #tpu.dot_dimension_numbers<[1], [0], [0], [1], [0, 0, 1, 1], [], []>} : vector<8x8xbf16>, vector<8x8xbf16>, vector<8x8xf32> -> vector<8x8xf32>
      %55 = arith.addf %52, %54 : vector<8x8xf32>
      %56 = arith.index_cast %arg24 : i32 to index
      %c0_29 = arith.constant 0 : index
      %c0_30 = arith.constant 0 : index
      %57 = vector.load %arg22[%56, %c0_29, %c0_30] : memref<4x8x8xf32, #tpu.memory_space<vmem>>, vector<1x8x8xf32>
      %58 = vector.shape_cast %57 : vector<1x8x8xf32> to vector<8x8xf32>
      %59 = vector.shape_cast %55 : vector<8x8xf32> to vector<1x8x8xf32>
      tpu.vector_store %arg22[%56, %c0_29, %c0_30], %59 {strides = array<i32>} : memref<4x8x8xf32, #tpu.memory_space<vmem>>, vector<1x8x8xf32>,
      %60 = arith.index_cast %arg24 : i32 to index
      %c0_31 = arith.constant 0 : index
      %c0_32 = arith.constant 0 : index
      %61 = vector.load %arg20[%60, %c0_31, %c0_32] : memref<4x8x1xf32, #tpu.memory_space<vmem>>, vector<1x8x1xf32>
      %62 = vector.shape_cast %61 : vector<1x8x1xf32> to vector<8x1xf32>
      %63 = vector.shape_cast %31 : vector<8x1xf32> to vector<1x8x1xf32>
      tpu.vector_store %arg20[%60, %c0_31, %c0_32], %63 {strides = array<i32>} : memref<4x8x1xf32, #tpu.memory_space<vmem>>, vector<1x8x1xf32>,
    }
    %c4_i32_6 = arith.constant 4 : i32
    %c0_i32_7 = arith.constant 0 : i32
    %11 = arith.cmpi eq, %arg2, %c0_i32_7 : i32
    %12 = arith.extui %11 : i1 to i32
    %c0_i32_8 = arith.constant 0 : i32
    %13 = arith.cmpi ne, %12, %c0_i32_8 : i32
    scf.if %13 {
      %c0_9 = arith.constant 0 : index
      %c0_10 = arith.constant 0 : index
      %c0_11 = arith.constant 0 : index
      %14 = vector.load %arg22[%c0_9, %c0_10, %c0_11] : memref<4x8x8xf32, #tpu.memory_space<vmem>>, vector<1x8x8xf32>
      %15 = vector.shape_cast %14 : vector<1x8x8xf32> to vector<8x8xf32>
      %c0_12 = arith.constant 0 : index
      %c0_13 = arith.constant 0 : index
      %c0_14 = arith.constant 0 : index
      %16 = vector.load %arg21[%c0_12, %c0_13, %c0_14] : memref<4x8x1xf32, #tpu.memory_space<vmem>>, vector<1x8x1xf32>
      %17 = vector.shape_cast %16 : vector<1x8x1xf32> to vector<8x1xf32>
      %18 = tpu.reciprocal %17 {approx = true} : vector<8x1xf32> -> vector<8x1xf32>
      %19 = vector.broadcast %18 : vector<8x1xf32> to vector<8x8xf32>
      %20 = arith.mulf %15, %19 : vector<8x8xf32>
      %21 = arith.truncf %20 : vector<8x8xf32> to vector<8x8xbf16>
      %c0_15 = arith.constant 0 : index
      %c0_16 = arith.constant 0 : index
      %22 = vector.load %arg23[%c0_15, %c0_16] : memref<8x32xbf16, #tpu.memory_space<vmem>>, vector<8x8xbf16>
      tpu.vector_store %arg23[%c0_15, %c0_16], %21 {strides = array<i32>} : memref<8x32xbf16, #tpu.memory_space<vmem>>, vector<8x8xbf16>,
      %c1 = arith.constant 1 : index
      %c0_17 = arith.constant 0 : index
      %c0_18 = arith.constant 0 : index
      %23 = vector.load %arg22[%c1, %c0_17, %c0_18] : memref<4x8x8xf32, #tpu.memory_space<vmem>>, vector<1x8x8xf32>
      %24 = vector.shape_cast %23 : vector<1x8x8xf32> to vector<8x8xf32>
      %c1_19 = arith.constant 1 : index
      %c0_20 = arith.constant 0 : index
      %c0_21 = arith.constant 0 : index
      %25 = vector.load %arg21[%c1_19, %c0_20, %c0_21] : memref<4x8x1xf32, #tpu.memory_space<vmem>>, vector<1x8x1xf32>
      %26 = vector.shape_cast %25 : vector<1x8x1xf32> to vector<8x1xf32>
      %27 = tpu.reciprocal %26 {approx = true} : vector<8x1xf32> -> vector<8x1xf32>
      %28 = vector.broadcast %27 : vector<8x1xf32> to vector<8x8xf32>
      %29 = arith.mulf %24, %28 : vector<8x8xf32>
      %30 = arith.truncf %29 : vector<8x8xf32> to vector<8x8xbf16>
      %c0_22 = arith.constant 0 : index
      %c8 = arith.constant 8 : index
      %31 = vector.load %arg23[%c0_22, %c8] : memref<8x32xbf16, #tpu.memory_space<vmem>>, vector<8x8xbf16>
      tpu.vector_store %arg23[%c0_22, %c8], %30 {strides = array<i32>} : memref<8x32xbf16, #tpu.memory_space<vmem>>, vector<8x8xbf16>,
      %c2 = arith.constant 2 : index
      %c0_23 = arith.constant 0 : index
      %c0_24 = arith.constant 0 : index
      %32 = vector.load %arg22[%c2, %c0_23, %c0_24] : memref<4x8x8xf32, #tpu.memory_space<vmem>>, vector<1x8x8xf32>
      %33 = vector.shape_cast %32 : vector<1x8x8xf32> to vector<8x8xf32>
      %c2_25 = arith.constant 2 : index
      %c0_26 = arith.constant 0 : index
      %c0_27 = arith.constant 0 : index
      %34 = vector.load %arg21[%c2_25, %c0_26, %c0_27] : memref<4x8x1xf32, #tpu.memory_space<vmem>>, vector<1x8x1xf32>
      %35 = vector.shape_cast %34 : vector<1x8x1xf32> to vector<8x1xf32>
      %36 = tpu.reciprocal %35 {approx = true} : vector<8x1xf32> -> vector<8x1xf32>
      %37 = vector.broadcast %36 : vector<8x1xf32> to vector<8x8xf32>
      %38 = arith.mulf %33, %37 : vector<8x8xf32>
      %39 = arith.truncf %38 : vector<8x8xf32> to vector<8x8xbf16>
      %c0_28 = arith.constant 0 : index
      %c16 = arith.constant 16 : index
      %40 = vector.load %arg23[%c0_28, %c16] : memref<8x32xbf16, #tpu.memory_space<vmem>>, vector<8x8xbf16>
      tpu.vector_store %arg23[%c0_28, %c16], %39 {strides = array<i32>} : memref<8x32xbf16, #tpu.memory_space<vmem>>, vector<8x8xbf16>,
      %c3 = arith.constant 3 : index
      %c0_29 = arith.constant 0 : index
      %c0_30 = arith.constant 0 : index
      %41 = vector.load %arg22[%c3, %c0_29, %c0_30] : memref<4x8x8xf32, #tpu.memory_space<vmem>>, vector<1x8x8xf32>
      %42 = vector.shape_cast %41 : vector<1x8x8xf32> to vector<8x8xf32>
      %c3_31 = arith.constant 3 : index
      %c0_32 = arith.constant 0 : index
      %c0_33 = arith.constant 0 : index
      %43 = vector.load %arg21[%c3_31, %c0_32, %c0_33] : memref<4x8x1xf32, #tpu.memory_space<vmem>>, vector<1x8x1xf32>
      %44 = vector.shape_cast %43 : vector<1x8x1xf32> to vector<8x1xf32>
      %45 = tpu.reciprocal %44 {approx = true} : vector<8x1xf32> -> vector<8x1xf32>
      %46 = vector.broadcast %45 : vector<8x1xf32> to vector<8x8xf32>
      %47 = arith.mulf %42, %46 : vector<8x8xf32>
      %48 = arith.truncf %47 : vector<8x8xf32> to vector<8x8xbf16>
      %c0_34 = arith.constant 0 : index
      %c24 = arith.constant 24 : index
      %49 = vector.load %arg23[%c0_34, %c24] : memref<8x32xbf16, #tpu.memory_space<vmem>>, vector<8x8xbf16>
      tpu.vector_store %arg23[%c0_34, %c24], %48 {strides = array<i32>} : memref<8x32xbf16, #tpu.memory_space<vmem>>, vector<8x8xbf16>,
      %c0_35 = arith.constant 0 : index
      %c0_36 = arith.constant 0 : index
      %50 = vector.load %arg23[%c0_35, %c0_36] : memref<8x32xbf16, #tpu.memory_space<vmem>>, vector<8x32xbf16>
      %c0_37 = arith.constant 0 : index
      %c0_38 = arith.constant 0 : index
      %51 = vector.load %arg12[%c0_37, %c0_38] : memref<32x32xbf16, #tpu.memory_space<vmem>>, vector<32x32xbf16>
      %cst_39 = arith.constant dense<0.000000e+00> : vector<8x32xf32>
      %52 = tpu.matmul %50, %51, %cst_39 {dimension_numbers = #tpu.dot_dimension_numbers<[1], [0], [0], [1], [0, 0, 1, 1], [], []>} : vector<8x32xbf16>, vector<32x32xbf16>, vector<8x32xf32> -> vector<8x32xf32>
      %c0_40 = arith.constant 0 : index
      %c0_41 = arith.constant 0 : index
      %c0_42 = arith.constant 0 : index
      %53 = vector.load %arg3[%c0_40, %c0_41, %c0_42] : memref<1x8x32xf32, #tpu.memory_space<vmem>>, vector<1x8x32xf32>
      %54 = vector.shape_cast %53 : vector<1x8x32xf32> to vector<8x32xf32>
      %55 = arith.addf %54, %52 : vector<8x32xf32>
      %c0_43 = arith.constant 0 : index
      %c0_44 = arith.constant 0 : index
      %56 = vector.load %arg13[%c0_43, %c0_44] : memref<1x32xf32, #tpu.memory_space<vmem>>, vector<1x32xf32>
      %57 = vector.broadcast %56 : vector<1x32xf32> to vector<8x32xf32>
      %58 = arith.addf %55, %57 : vector<8x32xf32>
      %c0_45 = arith.constant 0 : index
      %c0_46 = arith.constant 0 : index
      %59 = vector.load %arg8[%c0_45, %c0_46] : memref<1x32xf32, #tpu.memory_space<vmem>>, vector<1x32xf32>
      %c0_47 = arith.constant 0 : index
      %c0_48 = arith.constant 0 : index
      %60 = vector.load %arg9[%c0_47, %c0_48] : memref<1x32xf32, #tpu.memory_space<vmem>>, vector<1x32xf32>
      %cst_49 = arith.constant dense<0.000000e+00> : vector<8xf32>
      %61 = vector.multi_reduction <add>, %58, %cst_49 [1] : vector<8x32xf32> to vector<8xf32>
      %62 = vector.shape_cast %61 : vector<8xf32> to vector<8x1xf32>
      %cst_50 = arith.constant 3.200000e+01 : f32
      %63 = vector.broadcast %cst_50 : f32 to vector<8x1xf32>
      %64 = arith.divf %62, %63 : vector<8x1xf32>
      %65 = vector.broadcast %64 : vector<8x1xf32> to vector<8x32xf32>
      %66 = arith.subf %58, %65 : vector<8x32xf32>
      %67 = arith.mulf %66, %66 : vector<8x32xf32>
      %cst_51 = arith.constant dense<0.000000e+00> : vector<8xf32>
      %68 = vector.multi_reduction <add>, %67, %cst_51 [1] : vector<8x32xf32> to vector<8xf32>
      %69 = vector.shape_cast %68 : vector<8xf32> to vector<8x1xf32>
      %cst_52 = arith.constant 3.100000e+01 : f32
      %70 = vector.broadcast %cst_52 : f32 to vector<8x1xf32>
      %71 = arith.divf %69, %70 : vector<8x1xf32>
      %72 = vector.broadcast %59 : vector<1x32xf32> to vector<8x32xf32>
      %73 = arith.mulf %72, %66 : vector<8x32xf32>
      %74 = math.sqrt %71 : vector<8x1xf32>
      %cst_53 = arith.constant 9.99999997E-7 : f32
      %75 = vector.broadcast %cst_53 : f32 to vector<8x1xf32>
      %76 = arith.addf %74, %75 : vector<8x1xf32>
      %77 = vector.broadcast %76 : vector<8x1xf32> to vector<8x32xf32>
      %78 = arith.divf %73, %77 : vector<8x32xf32>
      %79 = vector.broadcast %60 : vector<1x32xf32> to vector<8x32xf32>
      %80 = arith.addf %78, %79 : vector<8x32xf32>
      %81 = arith.truncf %80 : vector<8x32xf32> to vector<8x32xbf16>
      %c0_54 = arith.constant 0 : index
      %c0_55 = arith.constant 0 : index
      %82 = vector.load %arg14[%c0_54, %c0_55] : memref<32x2048xbf16, #tpu.memory_space<vmem>>, vector<32x2048xbf16>
      %cst_56 = arith.constant dense<0.000000e+00> : vector<8x2048xf32>
      %83 = tpu.matmul %81, %82, %cst_56 {dimension_numbers = #tpu.dot_dimension_numbers<[1], [0], [0], [1], [0, 0, 1, 1], [], []>} : vector<8x32xbf16>, vector<32x2048xbf16>, vector<8x2048xf32> -> vector<8x2048xf32>
      %c0_57 = arith.constant 0 : index
      %c0_58 = arith.constant 0 : index
      %84 = vector.load %arg15[%c0_57, %c0_58] : memref<1x2048xf32, #tpu.memory_space<vmem>>, vector<1x2048xf32>
      %85 = vector.broadcast %84 : vector<1x2048xf32> to vector<8x2048xf32>
      %86 = arith.addf %83, %85 : vector<8x2048xf32>
      %cst_59 = arith.constant 0.000000e+00 : f32
      %87 = vector.broadcast %cst_59 : f32 to vector<8x2048xf32>
      %88 = arith.maximumf %86, %87 : vector<8x2048xf32>
      %89 = arith.truncf %88 : vector<8x2048xf32> to vector<8x2048xbf16>
      %c0_60 = arith.constant 0 : index
      %c0_61 = arith.constant 0 : index
      %90 = vector.load %arg16[%c0_60, %c0_61] : memref<2048x32xbf16, #tpu.memory_space<vmem>>, vector<2048x32xbf16>
      %cst_62 = arith.constant dense<0.000000e+00> : vector<8x32xf32>
      %91 = tpu.matmul %89, %90, %cst_62 {dimension_numbers = #tpu.dot_dimension_numbers<[1], [0], [0], [1], [0, 0, 1, 1], [], []>} : vector<8x2048xbf16>, vector<2048x32xbf16>, vector<8x32xf32> -> vector<8x32xf32>
      %c0_63 = arith.constant 0 : index
      %c0_64 = arith.constant 0 : index
      %92 = vector.load %arg17[%c0_63, %c0_64] : memref<1x32xf32, #tpu.memory_space<vmem>>, vector<1x32xf32>
      %93 = vector.broadcast %92 : vector<1x32xf32> to vector<8x32xf32>
      %94 = arith.addf %91, %93 : vector<8x32xf32>
      %95 = arith.addf %58, %94 : vector<8x32xf32>
      %c0_65 = arith.constant 0 : index
      %c0_66 = arith.constant 0 : index
      %c0_67 = arith.constant 0 : index
      %96 = vector.load %arg18[%c0_65, %c0_66, %c0_67] : memref<1x8x32xf32, #tpu.memory_space<vmem>>, vector<1x8x32xf32>
      %97 = vector.shape_cast %96 : vector<1x8x32xf32> to vector<8x32xf32>
      %98 = vector.shape_cast %95 : vector<8x32xf32> to vector<1x8x32xf32>
      tpu.vector_store %arg18[%c0_65, %c0_66, %c0_67], %98 {strides = array<i32>} : memref<1x8x32xf32, #tpu.memory_space<vmem>>, vector<1x8x32xf32>,
    } else {
    }
    return
  }
  func.func @transform_0(%arg0: i32, %arg1: i32, %arg2: i32) -> (i32, i32, i32) {
    %c0_i32 = arith.constant 0 : i32
    %c0_i32_0 = arith.constant 0 : i32
    return %arg0, %arg1, %c0_i32 : i32, i32, i32
  }
  func.func @transform_1(%arg0: i32, %arg1: i32, %arg2: i32) -> (i32, i32, i32) {
    %c0_i32 = arith.constant 0 : i32
    %c0_i32_0 = arith.constant 0 : i32
    return %arg0, %arg1, %c0_i32 : i32, i32, i32
  }
  func.func @transform_2(%arg0: i32, %arg1: i32, %arg2: i32) -> (i32, i32, i32, i32) {
    %c0_i32 = arith.constant 0 : i32
    %c0_i32_0 = arith.constant 0 : i32
    %c0_i32_1 = arith.constant 0 : i32
    return %arg0, %c0_i32, %arg2, %c0_i32_0 : i32, i32, i32, i32
  }
  func.func @transform_3(%arg0: i32, %arg1: i32, %arg2: i32) -> (i32, i32, i32, i32) {
    %c0_i32 = arith.constant 0 : i32
    %c0_i32_0 = arith.constant 0 : i32
    %c0_i32_1 = arith.constant 0 : i32
    return %arg0, %c0_i32, %arg2, %c0_i32_0 : i32, i32, i32, i32
  }
  func.func @transform_4(%arg0: i32, %arg1: i32, %arg2: i32) -> (i32, i32, i32) {
    %c0_i32 = arith.constant 0 : i32
    %c0_i32_0 = arith.constant 0 : i32
    return %arg0, %c0_i32, %arg2 : i32, i32, i32
  }
  func.func @transform_5(%arg0: i32, %arg1: i32, %arg2: i32) -> (i32, i32) {
    %c0_i32 = arith.constant 0 : i32
    %c0_i32_0 = arith.constant 0 : i32
    %c0_i32_1 = arith.constant 0 : i32
    return %c0_i32, %c0_i32_0 : i32, i32
  }
  func.func @transform_6(%arg0: i32, %arg1: i32, %arg2: i32) -> (i32, i32) {
    %c0_i32 = arith.constant 0 : i32
    %c0_i32_0 = arith.constant 0 : i32
    %c0_i32_1 = arith.constant 0 : i32
    return %c0_i32, %c0_i32_0 : i32, i32
  }
  func.func @transform_7(%arg0: i32, %arg1: i32, %arg2: i32) -> (i32, i32) {
    %c0_i32 = arith.constant 0 : i32
    %c0_i32_0 = arith.constant 0 : i32
    %c0_i32_1 = arith.constant 0 : i32
    return %c0_i32, %c0_i32_0 : i32, i32
  }
  func.func @transform_8(%arg0: i32, %arg1: i32, %arg2: i32) -> (i32, i32) {
    %c0_i32 = arith.constant 0 : i32
    %c0_i32_0 = arith.constant 0 : i32
    %c0_i32_1 = arith.constant 0 : i32
    return %c0_i32, %c0_i32_0 : i32, i32
  }
  func.func @transform_9(%arg0: i32, %arg1: i32, %arg2: i32) -> (i32, i32) {
    %c0_i32 = arith.constant 0 : i32
    %c0_i32_0 = arith.constant 0 : i32
    %c0_i32_1 = arith.constant 0 : i32
    return %c0_i32, %c0_i32_0 : i32, i32
  }
  func.func @transform_10(%arg0: i32, %arg1: i32, %arg2: i32) -> (i32, i32) {
    %c0_i32 = arith.constant 0 : i32
    %c0_i32_0 = arith.constant 0 : i32
    %c0_i32_1 = arith.constant 0 : i32
    return %c0_i32, %c0_i32_0 : i32, i32
  }
  func.func @transform_11(%arg0: i32, %arg1: i32, %arg2: i32) -> (i32, i32) {
    %c0_i32 = arith.constant 0 : i32
    %c0_i32_0 = arith.constant 0 : i32
    %c0_i32_1 = arith.constant 0 : i32
    return %c0_i32, %c0_i32_0 : i32, i32
  }
  func.func @transform_12(%arg0: i32, %arg1: i32, %arg2: i32) -> (i32, i32) {
    %c0_i32 = arith.constant 0 : i32
    %c0_i32_0 = arith.constant 0 : i32
    %c0_i32_1 = arith.constant 0 : i32
    return %c0_i32, %c0_i32_0 : i32, i32
  }
  func.func @transform_13(%arg0: i32, %arg1: i32, %arg2: i32) -> (i32, i32) {
    %c0_i32 = arith.constant 0 : i32
    %c0_i32_0 = arith.constant 0 : i32
    %c0_i32_1 = arith.constant 0 : i32
    return %c0_i32, %c0_i32_0 : i32, i32
  }
  func.func @transform_14(%arg0: i32, %arg1: i32, %arg2: i32) -> (i32, i32) {
    %c0_i32 = arith.constant 0 : i32
    %c0_i32_0 = arith.constant 0 : i32
    %c0_i32_1 = arith.constant 0 : i32
    return %c0_i32, %c0_i32_0 : i32, i32
  }
  func.func @transform_15(%arg0: i32, %arg1: i32, %arg2: i32) -> (i32, i32, i32) {
    %c0_i32 = arith.constant 0 : i32
    %c0_i32_0 = arith.constant 0 : i32
    return %arg0, %arg1, %c0_i32 : i32, i32, i32
  }
}

</mosaic_0001>

<bundles_post_ra>
// kernel: tpu_custom_call.1
= control target key start
LH: loop header
LB: loop body
LE: loop exit
PB: predicated region body
PF: predicated region fallthrough
CT: control target
= control target key end

     0   :  { %s4926_s0 = inlined_call_operand.vmem [shape: f32[2,8,32], index: 0, kind: input, shape index: {}]   ;;  %s4927_s1 = inlined_call_operand.vmem [shape: bf16[2,8,32], index: 1, kind: input, shape index: {}]   ;;  %s4928_s2 = inlined_call_operand.vmem [shape: bf16[2,4,8,8], index: 2, kind: input, shape index: {}]   ;;  %s4929_s3 = inlined_call_operand.vmem [shape: bf16[2,4,8,8], index: 3, kind: input, shape index: {}]   ;;  %s4930_s4 = inlined_call_operand.vmem [shape: f32[2,1,8], index: 4, kind: input, shape index: {}]   ;;  %s4931_s5 = inlined_call_operand.vmem [shape: f32[1,32], index: 5, kind: input, shape index: {}]   ;;  %s4932_s6 = inlined_call_operand.vmem [shape: f32[1,32], index: 6, kind: input, shape index: {}]   ;;  %s4933_s7 = inlined_call_operand.vmem [shape: bf16[32,32], index: 7, kind: input, shape index: {}]   ;;  %s4934_s8 = inlined_call_operand.vmem [shape: f32[1,32], index: 8, kind: input, shape index: {}]   ;;  %s4935_s9 = inlined_call_operand.vmem [shape: bf16[32,32], index: 9, kind: input, shape index: {}]   ;;  %s4936_s10 = inlined_call_operand.vmem [shape: f32[1,32], index: 10, kind: input, shape index: {}]   ;;  %s4937_s11 = inlined_call_operand.vmem [shape: bf16[32,2048], index: 11, kind: input, shape index: {}]   ;;  %s4938_s12 = inlined_call_operand.vmem [shape: f32[1,2048], index: 12, kind: input, shape index: {}]   ;;  %s4939_s13 = inlined_call_operand.vmem [shape: bf16[2048,32], index: 13, kind: input, shape index: {}]   ;;  %s4940_s14 = inlined_call_operand.vmem [shape: f32[1,32], index: 14, kind: input, shape index: {}]   ;;  %s4941_s15 = inlined_call_operand.hbm [shape: f32[2,8,32], index: 15, kind: output, shape index: {}]  }
   0x1   :  { %4956 = sst [smem:[#allocation20_spill]] %s4933_s7 }
   0x2   :  { %4957 = sst [smem:[#allocation21_spill]] %s4938_s12 }
   0x3   :  { %4958 = sst [smem:[#allocation22_spill]] %s4940_s14 }
   0x4   :  { %4959 = sst [smem:[#allocation23_spill]] %s4941_s15 }
   0x5   :  { %20 = vsyncpa [#allocation8], 0 }
   0x6   :  { %22 = vsyncpa [#allocation8 + $0x1], 0  ;;  %s4084_s18 = smov 0   ;;  %s4086_s19 = smov 0  }
   0x7   :  { %s4088_s20 = smov 0   ;;  %s4090_s21 = smov 0  }
   0x8   :  { %s4092_s22 = smov 0   ;;  %s4094_s23 = smov 0  }
   0x9 LB: > { %4960 = sst [smem:[#allocation10_spill]] %s3964_s18  ;;  %s3249_s24 = sadd.s32 4294967295, %s3984_s23   ;;  %s3984_s23 = sphi %s4094_s23, %s28_s23   ;;  %s3980_s22 = sphi %s4092_s22, %s4987_s22   ;;  %s3976_s21 = sphi %s4090_s21, %s4986_s21   ;;  %s3972_s20 = sphi %s4088_s20, %s4985_s20   ;;  %s3968_s19 = sphi %s4086_s19, %s4984_s19   ;;  %s3964_s18 = sphi %s4084_s18, %s4983_s18  }
   0xa   : > { %4961 = sst [smem:[#allocation11_spill]] %s3968_s19  ;;  %s3250_s25 = sadd.s32 4294967294, %s3984_s23  }
   0xb   : > { %4962 = sst [smem:[#allocation12_spill]] %s3972_s20  ;;  %s47_s26 = sadd.s32 1, %s3980_s22 }
   0xc   : > { %4963 = sst [smem:[#allocation13_spill]] %s3976_s21  ;;  %s406_s27 = sadd.s32 1, %s3972_s20 }
   0xd   : > { %4964 = sst [smem:[#allocation14_spill]] %s3980_s22  ;;  %p49_p0 = scmp.ge.s32.totalorder %s47_s26, 2 }
   0xe   : > { %4965 = sst [smem:[#allocation15_spill]] %s3984_s23  ;;  %p416_p1 = scmp.ne.s32.totalorder %s3972_s20, %s3968_s19 }
   0xf   : > { %p417_p2 = scmp.eq.s32.totalorder %s3249_s24, 1  ;;  %p422_p3 = scmp.ne.s32.totalorder %s3968_s19, %s3964_s18 }
  0x10   : > { %s4989_s26 = smov (%p49_p0, %s47_s26), 0  ;;  %p423_p5 = scmp.eq.s32.totalorder %s3250_s25, 1 }
  0x11   : > { %4966 = sst [smem:[#allocation16_spill]] %s4989_s26  ;;  %p4124_p4 = por %p417_p2, %p416_p1 }
  0x12   : > { %s401_s29 = ssub.s32 %s3980_s22, %s4989_s26  ;;  %p3253_p6 = scmp.ge.s32.totalorder %s3984_s23, 1 }
  0x13   : > { %s4967_s28 = scalar_select %p4124_p4, 1, 0 }
  0x14   : > { %p404_p7 = scmp.eq.s32.totalorder %s401_s29, 0  ;;  %p4131_p8 = por %p423_p5, %p422_p3 }
  0x15   : > { %4968 = sst [smem:[#allocation17_spill]] %s4967_s28  ;;  %p522_p9 = scmp.lt.s32.totalorder %s3984_s23, 3 }
  0x16   : > { %s4969_s30 = scalar_select %p4131_p8, 1, 0 }
  0x17   : > { %s4137_s16 = scalar_select %p404_p7, %s3972_s20, %s406_s27  }
  0x18   : > { %4970 = sst [smem:[#allocation18_spill]] %s4969_s30  ;;  %p523_p10 = pnand %p3253_p6, %p522_p9 }
  0x19   : > { %4971 = sst [smem:[#allocation19_spill]] %s4137_s16  ;;  %s4943_s17 = sand.u32 (!%p523_p10), 1, %s3968_s19   ;;  %vm642_vm0 = vcmask (!%p523_p10), 7168   ;;  %vm651_vm1 = vcmask (!%p523_p10), 64512   ;;  %v3990_v1 = vmov (!%p523_p10), -inf   ;;  %v3991_v2 = vmov (!%p523_p10), 0.0  }
  0x1a   : > { %526 = sbr.rel (%p523_p10) target bundleno = 2410 (0x96a), region = 80  ;;  %s4972_s7 = sld [smem:[#allocation20_spill]] (!%p523_p10)  ;;  %643 = vst.msk [vmem:[#allocation3] sm:$0xff] (!%p523_p10), %vm642_vm0, %v3990_v1  ;;  %644 = vst.msk [vmem:[#allocation3 + $0x8] sm:$0xff] (!%p523_p10), %vm642_vm0, %v3990_v1  ;;  %3646 = vmatprep.subr.bf16.mxu0 (!%p523_p10), %v3991_v2  ;;  %vm3992_vm2 = vmmov (!%p523_p10), 0   ;;  %vm680_vm3 = vcmask (!%p523_p10), 261120  }
  0x1b   : > { %s4145_s25 = sshll.u32 (!%p523_p10), %s4943_s17, 3  ;;  %645 = vst.msk [vmem:[#allocation3 + $0x10] sm:$0xff] (!%p523_p10), %vm642_vm0, %v3990_v1  ;;  %646 = vst.msk [vmem:[#allocation3 + $0x18] sm:$0xff] (!%p523_p10), %vm642_vm0, %v3990_v1  ;;  %3650 = vmatprep.mubr.msk.bf16.mxu0 (!%p523_p10), %vm3992_vm2, %v3991_v2  ;;  %p601_p11 = scmp.lt.s32.totalorder (!%p523_p10), %s3976_s21, 1  ;;  %v3261_v7 = vld [vmem:[%s4934_s8] ss:$0 sm:$0xff] (!%p523_p10) }
  0x1c   : > { %647 = vst.msk [vmem:[#allocation4] sm:$0xff] (!%p523_p10), %vm642_vm0, %v3991_v2  ;;  %648 = vst.msk [vmem:[#allocation4 + $0x8] sm:$0xff] (!%p523_p10), %vm642_vm0, %v3991_v2  ;;  %vm726_vm5 = vcmask (!%p523_p10), 60416   ;;  %s3994_s12 = smov (!%p523_p10), 120   ;;  %s3995_s14 = smov (!%p523_p10), 112  }
  0x1d   : > { %649 = vst.msk [vmem:[#allocation4 + $0x10] sm:$0xff] (!%p523_p10), %vm642_vm0, %v3991_v2  ;;  %650 = vst.msk [vmem:[#allocation4 + $0x18] sm:$0xff] (!%p523_p10), %vm642_vm0, %v3991_v2  ;;  %s4209_s19 = smov (!%p523_p10), 0  }
  0x1e   : > { %652 = vst.msk [vmem:[#allocation5] sm:$0xff] (!%p523_p10), %vm651_vm1, %v3991_v2  ;;  %653 = vst.msk [vmem:[#allocation5 + $0x8] sm:$0xff] (!%p523_p10), %vm651_vm1, %v3991_v2 }
  0x1f   : > { %654 = vst.msk [vmem:[#allocation5 + $0x10] sm:$0xff] (!%p523_p10), %vm651_vm1, %v3991_v2  ;;  %655 = vst.msk [vmem:[#allocation5 + $0x18] sm:$0xff] (!%p523_p10), %vm651_vm1, %v3991_v2 }
  0x20   : > { %v3750_v0 = vld [vmem:[%s4972_s7] sm:$0xff] (!%p523_p10)   ;;  %v3751_v3 = vld [vmem:[%s4972_s7 + $0x8] sm:$0xff] (!%p523_p10)  }
  0x21   : > { %3647 = vmatpush3.bf16.msra.mxu0 %v3750_v0  ;;  %s602_s29 = scalar_select %p601_p11, %s3976_s21, 1 }
  0x22   : > { %3648 = vmatprep.subr.bf16.mxu0 %v3991_v2 }
  0x23   : > { %s3255_s24 = sshll.u32 %s602_s29, 3  ;;  %s3256_s17 = sshll.u32 %s602_s29, 2 }
  0x24   : > { %s4179_s16 = scalar_lea.vmem %s4926_s0, %s3255_s24  ;;  %s614_s7 = scalar_lea.vmem %s4927_s1, %s3256_s17 }
  0x25   : > { %3649 = vmatpush3.bf16.msra.mxu0 %v3751_v3  ;;  %s3454_s20 = sshll.u32 %s602_s29, 4  ;;  %s636_s15 = scalar_lea.vmem %s4930_s4, %s602_s29  ;;  %v656_v4 = vld [vmem:[%s614_s7] sm:$0xf] }
  0x26   : > { %s4190_s21 = scalar_lea.vmem %s4928_s2, %s3454_s20  ;;  %s4195_s22 = scalar_lea.vmem %s4929_s3, %s3454_s20  ;;  %v746_v5 = vld [vmem:[%s636_s15] sm:$0x1] }
  0x27   : > { %vm747_vm4 = vcmp.eq.f32.partialorder %v746_v5, 0.0  ;;  %s3993_s7 = smov 104   ;;  %s600_s15 = scalar_lea.vmem [#allocation7], %s4145_s25 }
  0x28   : > { %3651 = vmatmul.mubr.msk.bf16.vlgmr.msra.gmra.mrb[0].mxu0 %vm680_vm3, %v656_v4  ;;  %v4199_v6 = vsel %vm747_vm4, -1e+09, %v3991_v2 }
  0xfb   : > { %v718_v8 = vpop.f32.mrb[0].mxu0 }
  0xfc   : > { %v719_v9 = vadd.f32 %v3261_v7, %v718_v8  ;;  %v3652_v10 = vpop.f32.mrb[1].mxu0 }
  0xfd   : > { %v721_v11 = vpop.f32.mrb[2].mxu0 }
  0xfe   : > { %v724_v12 = vmul.f32 0.35355338, %v719_v9  ;;  %v3653_v13 = vpop.f32.mrb[3].mxu0 }
 0x100   : > { %v725_v14 = vpack.c.bf16 %v724_v12, %v724_v12 }
 0x102   : > { %741 = vrot.lane.b32.xlu1 %v725_v14, %s3993_s7  ;;  %731 = vrot.lane.b32.xlu0 %v725_v14, %s3994_s12  ;;  %727 = vst.msk [vmem:[#allocation2] sm:$0xf] %vm726_vm5, %v725_v14 }
 0x106   : > { %736 = vrot.lane.b32.xlu0 %v725_v14, %s3995_s14 }
 0x174   : > { %v742_v15 = vpop.permute.xlu1 %741  ;;  %v732_v16 = vpop.permute.xlu0 %731 }
 0x175   : > { %745 = vst.msk [vmem:[#allocation2 + $0xc] sm:$0xf] %vm726_vm5, %v742_v15  ;;  %735 = vst.msk [vmem:[#allocation2 + $0x4] sm:$0xf] %vm726_vm5, %v732_v16 }
 0x178   : > { %v737_v17 = vpop.permute.xlu0 %736 }
 0x179   : > { %740 = vst.msk [vmem:[#allocation2 + $0x8] sm:$0xf] %vm726_vm5, %v737_v17 }
 0x17a LB: >> { %v3996_v18 = vmov 0.0   ;;  %vm3997_vm6 = vmmov 0   ;;  %s4215_s20 = sshll.u32 %s3988_s19, 2  ;;  %v765_v22 = vlaneseq  ;;  %v3998_v32 = vmov 0   ;;  %s4231_s17 = sshll.u32 %s3988_s19, 3  ;;  %s3988_s19 = sphi %s4209_s19, %s754_s19  }
 0x17b   : >> { %3654 = vmatprep.subr.bf16.mxu0 %v3996_v18  ;;  %3656 = vmatprep.mubr.msk.bf16.mxu0 %vm3997_vm6, %v3996_v18  ;;  %s756_s28 = scalar_lea.vmem %s4190_s21, %s4215_s20  ;;  %s762_s30 = scalar_lea.vmem [#allocation2], %s4215_s20  ;;  %vm856_vm7 = vcmask 1043456  }
 0x17c   : >> { %3660 = vmatprep.subr.bf16.mxu1 %v3996_v18  ;;  %3662 = vmatprep.mubr.msk.bf16.mxu1 %vm3997_vm6, %v3996_v18  ;;  %v757_v19 = vld [vmem:[%s756_s28] sm:$0xf]  ;;  %v4222_v23 = vshrl.u32 %v765_v22, 7  ;;  %s818_s29 = scalar_lea.vmem [#allocation3], %s4231_s17  ;;  %s759_s24 = scalar_lea.vmem %s4195_s22, %s4215_s20 }
 0x17d   : >> { %v775_v20 = vsel %vm651_vm1, %v757_v19, 0  ;;  %3752 = vset.pattern.permute.xlu0 %v3998_v32  ;;  %3753 = vset.pattern.permute.xlu1 %v3998_v32  ;;  %v819_v33 = vld [vmem:[%s818_s29] sm:$0xff]  ;;  %s835_s18 = scalar_lea.vmem [#allocation4], %s4231_s17  ;;  %s844_s27 = scalar_lea.vmem [#allocation5], %s4231_s17 }
 0x17e   : >> { %3655 = vmatpush3.bf16.xpose.msra.mxu0 %v775_v20  ;;  %v4225_v24 = vsub.s32 0, %v4222_v23  ;;  %v760_v37 = vld [vmem:[%s759_s24] sm:$0xf]  ;;  %s754_s19 = sadd.s32 1, %s3988_s19  }
 0x17f   : >> { %v858_v38 = vsel %vm856_vm7, %v760_v37, 0  ;;  %v836_v47 = vld [vmem:[%s835_s18] sm:$0xff]  ;;  %p751_p12 = scmp.ge.s32.totalorder %s754_s19, 4  }
 0x180   : >> { %v763_v21 = vld [vmem:[%s762_s30] sm:$0xf]  ;;  %v768_v25 = vrot.slane %v4199_v6, %v4225_v24  ;;  %3661 = vmatpush3.bf16.msra.mxu1 %v858_v38  ;;  %3666 = vmatprep.subr.bf16.mxu0 (%p751_p12), %v3991_v2  ;;  %v3999_v62 = vmov (%p751_p12), 0   ;;  %v3761_v7 = vld [vmem:[%s4935_s9 + $0x8] sm:$0xff] (%p751_p12)   ;;  %s4000_s7 = smov (%p751_p12), 8   ;;  %s4001_s12 = smov (%p751_p12), 16  }
 0x181   : >> { %v845_v51 = vld [vmem:[%s844_s27] sm:$0xff]  ;;  %s4002_s14 = smov (%p751_p12), 24   ;;  %vm936_vm8 = vcmask (%p751_p12), 126016   ;;  %vm956_vm9 = vcmask (%p751_p12), 191616   ;;  %vm976_vm10 = vcmask (%p751_p12), 257216   ;;  %s4973_s30 = sld [smem:[#allocation21_spill]] (%p751_p12) }
 0x182   : > { %v3760_v5 = vld [vmem:[%s4935_s9] sm:$0xff] (%p751_p12)   ;;  %s4974_s17 = sld [smem:[#allocation22_spill]] (%p751_p12)  ;;  %s4976_s24 = sld [smem:[#allocation11_spill]] (%p751_p12) }
 0x183   : > { %s3095_s21 = sshll.u32 (%p751_p12), %s600_s15, 4  ;;  %s4978_s26 = sld [smem:[#allocation23_spill]] (%p751_p12)  ;;  %s4876_s21 = int_to_ptr.vmem [resolvable:$true] %s3095_s21 }
 0x184   : > { %s3902_s19 = scalar_lea.vmem (%p751_p12), %s4876_s21, 128  ;;  %s4003_s20 = smov (%p751_p12), [#allocation7]  }
 0x185   : >> { %3657 = vmatmul.mubr.msk.bf16.vlgmr.msra.gmra.mrb[0].mxu0 %vm651_vm1, %v763_v21  ;;  %p3903_p13 = scmp.ne.s32.totalorder (%p751_p12), %s4876_s21, %s3902_s19 }
 0x186   : > { %3670 = vmatprep.mubr.msk.bf16.mxu0 (%p751_p12), %vm3992_vm2, %v3991_v2  ;;  %3667 = vmatpush3.bf16.msra.mxu0 (%p751_p12), %v3760_v5 }
 0x187   : > { %3668 = vmatprep.subr.bf16.mxu0 (%p751_p12), %v3991_v2  ;;  %p3904_p0 = pnand (%p751_p12), %p3903_p13, %p4124_p4 }
 0x189   : > { %p3905_p1 = pneg (%p751_p12), %p3904_p0 }
 0x18a   : > { %3669 = vmatpush3.bf16.msra.mxu0 (%p751_p12), %v3761_v7 }
 0x258   : >> { %v811_v26 = vpop.f32.mrb[0].mxu0 }
 0x259   : >> { %v812_v27 = vadd.f32 %v811_v26, %v768_v25  ;;  %v3658_v28 = vpop.f32.mrb[1].mxu0 }
 0x25a   : >> { %v814_v29 = vpop.f32.mrb[2].mxu0  ;;  %v1039_v28 = vld [vmem:[%s4179_s16] sm:$0xff] (%p751_p12)  ;;  %s3906_s16 = sshll.u32 (%p751_p12), %s4003_s20, 4  ;;  %s3907_s16 = int_to_ptr.vmem [resolvable:$false] %s3906_s16 }
 0x25b   : >> { %v3659_v30 = vpop.f32.mrb[3].mxu0  ;;  %v820_v31 = vsel %vm651_vm1, %v812_v27, -inf  ;;  %s3908_s28 = scalar_lea.vmem (%p751_p12), %s3907_s16, 256  ;;  %p3909_p2 = scmp.lt.s32.totalorder (%p751_p12), %s4876_s21, %s3907_s16 }
 0x25c   : >> { %821 = vmax.xlane.f32.xlu0 %v820_v31  ;;  %v3278_v30 = vld [vmem:[%s4936_s10] ss:$0 sm:$0xff] (%p751_p12)  ;;  %p3910_p3 = scmp.lt.s32.totalorder (%p751_p12), %s3908_s28, %s3902_s19 }
 0x25e   : > { %p3911_p5 = por (%p751_p12), %p3910_p3, %p3909_p2 }
 0x260   : > { %p3912_p6 = pnand (%p751_p12), %p3911_p5, %p3905_p1 }
 0x2e9   : >> { %v822_v34 = vpop.xlane.xlu0 %821 }
 0x2ea   : >> { %v823_v35 = vmax.f32 %v819_v33, %v822_v34 }
 0x2ec   : >> { %v824_v36 = vsub.f32 %v819_v33, %v823_v35  ;;  %902 = vst.msk [vmem:[%s818_s29] sm:$0xff] %vm642_vm0, %v823_v35  ;;  %829 = vperm.xlu0 %3752, %v823_v35   ;;  %s4975_s29 = sld [smem:[#allocation13_spill]] (%p751_p12) }
 0x2ee   : >> { %v825_v45 = vmul.f32 1.442695, %v824_v36 }
 0x2f0   : > { %3758 = vset.pattern.permute.xlu0 (%p751_p12), %v3999_v62 }
 0x36b   : >> { %v830_v39 = vpop.permute.xlu0 %829 }
 0x36c   : >> { %v832_v40 = vsub.f32 %v812_v27, %v830_v39 }
 0x36e   : >> { %v833_v41 = vmul.f32 1.442695, %v832_v40 }
 0x370   : >> { %3754 = vpow2.f32 %v833_v41 }
 0x371   : >> { %3756 = vpow2.f32 %v825_v45 }
 0x37a   : >> { %v3755_v42 = vpop.eup %3754 }
 0x37b   : >> { %v838_v43 = vsel %vm651_vm1, %v3755_v42, 0.0  ;;  %v852_v44 = vpack.c.bf16 %v3755_v42, %v3755_v42  ;;  %v3757_v46 = vpop.eup %3756  ;;  %v1088_v42 = vld [vmem:[%s4937_s11] sm:$0xff] (%p751_p12) }
 0x37c   : >> { %839 = vadd.xlane.f32.xlu1 %v838_v43  ;;  %v837_v48 = vmul.f32 %v3757_v46, %v836_v47  ;;  %v1096_v43 = vld [vmem:[%s4937_s11 + $0x40] sm:$0xff] (%p751_p12) }
 0x37d   : >> { %3663 = vmatmul.mubr.msk.bf16.vlgmr.msra.gmra.mrb[0].mxu1 %vm651_vm1, %v852_v44  ;;  %v1089_v44 = vld [vmem:[%s4937_s11 + $0x8] sm:$0xff] (%p751_p12)  ;;  %v3282_v45 = vcombine.high (%p751_p12), %v1088_v42, %v1096_v43 }
 0x37e   : > { %1399 = vmatprep.mubr.bf16.mxu1 (%p751_p12), %v3999_v62 }
 0x37f   : > { %1367 = vmatprep.subr.bf16.mxu1 (%p751_p12), %v3282_v45  ;;  %v1095_v45 = vld [vmem:[%s4937_s11 + $0x38] sm:$0xff] (%p751_p12) }
 0x38d   : >> { %848 = vperm.xlu1 %3753, %v3757_v46   ;;  %v1097_v46 = vld [vmem:[%s4937_s11 + $0x48] sm:$0xff] (%p751_p12) }
 0x38e   : > { %v3283_v47 = vcombine.low (%p751_p12), %v1089_v44, %v1097_v46 }
 0x391   : > { %3759 = vset.pattern.permute.xlu1 (%p751_p12), %v3999_v62 }
 0x409   : >> { %v840_v49 = vpop.xlane.xlu1 %839 }
 0x40a   : >> { %v841_v50 = vadd.f32 %v840_v49, %v837_v48  ;;  %v3284_v48 = vcombine.high (%p751_p12), %v1089_v44, %v1097_v46  ;;  %v3281_v49 = vcombine.low (%p751_p12), %v1088_v42, %v1096_v43  ;;  %v1094_v43 = vld [vmem:[%s4937_s11 + $0x30] sm:$0xff] (%p751_p12)  ;;  %v1103_v46 = vld [vmem:[%s4937_s11 + $0x78] sm:$0xff] (%p751_p12) }
 0x40b   : > { %v1102_v44 = vld [vmem:[%s4937_s11 + $0x70] sm:$0xff] (%p751_p12) }
 0x40c   : >> { %843 = vst.msk [vmem:[%s835_s18] sm:$0xff] %vm642_vm0, %v841_v50  ;;  %1408 = vmatprep.subr.bf16.mxu0 (%p751_p12), %v3284_v48  ;;  %1368 = vmatpush1.bf16.msra.mxu1 (%p751_p12), %v3281_v49  ;;  %v1104_v50 = vld [vmem:[%s4937_s11 + $0x80] sm:$0xff] (%p751_p12)  ;;  %v3294_v49 = vcombine.high (%p751_p12), %v1094_v43, %v1102_v44 }
 0x40d   : >> { %v849_v52 = vpop.permute.xlu1 %848 }
 0x40e   : >> { %v851_v53 = vmul.f32 %v849_v52, %v845_v51  ;;  %v1112_v51 = vld [vmem:[%s4937_s11 + $0xc0] sm:$0xff] (%p751_p12)  ;;  %v1105_v52 = vld [vmem:[%s4937_s11 + $0x88] sm:$0xff] (%p751_p12) }
 0x413   : > { %v921_v59 = vld [vmem:[#allocation4 + $0x8] sm:$0xff] (%p751_p12)  ;;  %v961_v60 = vld [vmem:[#allocation4 + $0x18] sm:$0xff] (%p751_p12)  ;;  %v941_v61 = vld [vmem:[#allocation4 + $0x10] sm:$0xff] (%p751_p12) }
 0x414   : > { %3890 = vrcp.f32 (%p751_p12), %v921_v59  ;;  %v907_v63 = vld [vmem:[#allocation4] sm:$0xff] (%p751_p12) }
 0x415   : > { %3892 = vrcp.f32 (%p751_p12), %v961_v60  ;;  %v1098_v59 = vld [vmem:[%s4937_s11 + $0x50] sm:$0xff] (%p751_p12)  ;;  %v1091_v60 = vld [vmem:[%s4937_s11 + $0x18] sm:$0xff] (%p751_p12) }
 0x416   : > { %3894 = vrcp.f32 (%p751_p12), %v941_v61 }
 0x417   : > { %3896 = vrcp.f32 (%p751_p12), %v907_v63  ;;  %v1099_v63 = vld [vmem:[%s4937_s11 + $0x58] sm:$0xff] (%p751_p12) }
 0x41e   : > { %v3891_v0 = vpop.eup (%p751_p12), %3890 }
 0x41f   : > { %v3893_v1 = vpop.eup (%p751_p12), %3892  ;;  %925 = vperm.xlu0 (%p751_p12), %3758, %v3891_v0  }
 0x420   : > { %v3895_v3 = vpop.eup (%p751_p12), %3894  ;;  %965 = vperm.xlu1 (%p751_p12), %3759, %v3893_v1   ;;  %v3287_v1 = vcombine.low (%p751_p12), %v1091_v60, %v1099_v63 }
 0x421   : > { %v3897_v4 = vpop.eup (%p751_p12), %3896 }
 0x423   : > { %945 = vperm.xlu0 (%p751_p12), %3758, %v3895_v3   ;;  %v3288_v3 = vcombine.high (%p751_p12), %v1091_v60, %v1099_v63  ;;  %v3763_v63 = vld [vmem:[%s4939_s13 + $0xc0] sm:$0xff] (%p751_p12)  }
 0x424   : > { %911 = vperm.xlu1 (%p751_p12), %3759, %v3897_v4  }
 0x44d   : > { %753 = sbr.rel (!%p751_p12) target bundleno = 378 (0x17a), region = 157 }
 0x450   : >> { %v894_v54 = vpop.f32.mrb[0].mxu1 }
 0x451   : >> { %v900_v55 = vadd.f32 %v894_v54, %v851_v53  ;;  %v3664_v56 = vpop.f32.mrb[1].mxu1  ;;  %v3298_v53 = vcombine.high (%p751_p12), %v1104_v50, %v1112_v51  ;;  %v1113_v54 = vld [vmem:[%s4937_s11 + $0xc8] sm:$0xff] (%p751_p12) }
 0x452   : >> { %v897_v57 = vpop.f32.mrb[2].mxu1  ;;  %v3299_v56 = vcombine.low (%p751_p12), %v1105_v52, %v1113_v54 }
 0x453   : >> { %901 = vst.msk [vmem:[%s844_s27] sm:$0xff] %vm651_vm1, %v900_v55  ;;  %v3665_v58 = vpop.f32.mrb[3].mxu1  ;;  %v3297_v55 = vcombine.low (%p751_p12), %v1104_v50, %v1112_v51  ;;  %v3300_v57 = vcombine.high (%p751_p12), %v1105_v52, %v1113_v54  ;;  %1369 = vmatprep.subr.bf16.mxu1 (%p751_p12), %v3298_v53  ;;  %v3296_v50 = vcombine.high (%p751_p12), %v1095_v45, %v1103_v46  ;;  %v1110_v51 = vld [vmem:[%s4937_s11 + $0xb0] sm:$0xff] (%p751_p12)  ;;  %v1111_v53 = vld [vmem:[%s4937_s11 + $0xb8] sm:$0xff] (%p751_p12)  ;;  %s3451_s27 = sshll.u32 (%p751_p12), %s4975_s29, 7 }
 0x454   : > { %v1090_v58 = vld [vmem:[%s4937_s11 + $0x10] sm:$0xff]  ;;  %v1119_v54 = vld [vmem:[%s4937_s11 + $0xf8] sm:$0xff] }
 0x455   : > { %1370 = vmatpush1.bf16.msra.mxu1 %v3297_v55  ;;  %v3286_v61 = vcombine.high %v1090_v58, %v1098_v59  ;;  %v3285_v0 = vcombine.low %v1090_v58, %v1098_v59  ;;  %v1118_v52 = vld [vmem:[%s4937_s11 + $0xf0] sm:$0xff]  ;;  %v3293_v55 = vcombine.low %v1094_v43, %v1102_v44  ;;  %v3312_v58 = vcombine.high %v1111_v53, %v1119_v54 }
 0x456   : > { %v3309_v59 = vcombine.low %v1110_v51, %v1118_v52  ;;  %v3311_v60 = vcombine.low %v1111_v53, %v1119_v54 }
 0x457   : > { %1449 = vmatprep.subr.bf16.mxu1 %v3286_v61  ;;  %v3762_v61 = vld [vmem:[%s4939_s13 + $0x40] sm:$0xff]  }
 0x45a   : > { %v919_v6 = vld [vmem:[#allocation5 + $0x8] sm:$0xff]  ;;  %v959_v8 = vld [vmem:[#allocation5 + $0x18] sm:$0xff]  ;;  %v939_v13 = vld [vmem:[#allocation5 + $0x10] sm:$0xff] }
 0x45b   : > { %v906_v15 = vld [vmem:[#allocation5] sm:$0xff] }
 0x49e   : > { %v926_v9 = vpop.permute.xlu0 %925 }
 0x49f   : > { %v928_v10 = vmul.f32 %v926_v9, %v919_v6  ;;  %v966_v11 = vpop.permute.xlu1 %965 }
 0x4a0   : > { %v968_v12 = vmul.f32 %v966_v11, %v959_v8 }
 0x4a1   : > { %v3457_v14 = vpack.c.bf16 %v928_v10, %v928_v10 }
 0x4a2   : > { %v946_v16 = vpop.permute.xlu0 %945  ;;  %v3459_v17 = vpack.c.bf16 %v968_v12, %v968_v12  ;;  %v3279_v12 = vld [vmem:[%s4931_s5] ss:$0 sm:$0xff] }
 0x4a3   : > { %v948_v18 = vmul.f32 %v946_v16, %v939_v13  ;;  %933 = vrot.lane.b32.xlu0 %v3457_v14, %s4000_s7  ;;  %v912_v19 = vpop.permute.xlu1 %911  ;;  %s4874_s7 = scalar_lea.hbm %s4978_s26, %s3451_s27 }
 0x4a4   : > { %v914_v20 = vmul.f32 %v912_v19, %v906_v15  ;;  %v3280_v15 = vld [vmem:[%s4932_s6] ss:$0 sm:$0xff]  ;;  %v1107_v19 = vld [vmem:[%s4937_s11 + $0x98] sm:$0xff] }
 0x4a5   : > { %v3458_v21 = vpack.c.bf16 %v948_v18, %v948_v18  ;;  %v1114_v18 = vld [vmem:[%s4937_s11 + $0xd0] sm:$0xff] }
 0x4a6   : > { %v915_v22 = vpack.c.bf16 %v914_v20, %v914_v20  ;;  %v1115_v20 = vld [vmem:[%s4937_s11 + $0xd8] sm:$0xff] }
 0x4a7   : > { %953 = vrot.lane.b32.xlu1 %v3458_v21, %s4001_s12  ;;  %973 = vrot.lane.b32.xlu0 %v3459_v17, %s4002_s14  ;;  %v1106_v17 = vld [vmem:[%s4937_s11 + $0x90] sm:$0xff]  ;;  %s4979_s12 = sand.u32 1, %s4976_s24  }
 0x4a8   : > { %917 = vst.msk [vmem:[#allocation6] sm:$0xf] %vm726_vm5, %v915_v22  ;;  %s3081_s14 = scalar_lea.sflag [#allocation8], %s4979_s12 }
 0x515   : > { %v934_v2 = vpop.permute.xlu0 %933 }
 0x516   : > { %937 = vst.msk [vmem:[#allocation6] sm:$0xf] %vm936_vm8, %v934_v2  ;;  %v3302_v2 = vcombine.high %v1106_v17, %v1114_v18 }
 0x519   : > { %v954_v25 = vpop.permute.xlu1 %953  ;;  %v974_v26 = vpop.permute.xlu0 %973 }
 0x51a   : > { %957 = vst.msk [vmem:[#allocation6] sm:$0xf] %vm956_vm9, %v954_v25  ;;  %v3304_v25 = vcombine.high %v1107_v19, %v1115_v20 }
 0x51b   : > { %977 = vst.msk [vmem:[#allocation6] sm:$0xf] %vm976_vm10, %v974_v26  ;;  %v1092_v26 = vld [vmem:[%s4937_s11 + $0x20] sm:$0xff] }
 0x522   : > { %v978_v27 = vld [vmem:[#allocation6] sm:$0xf] }
 0x523   : > { %3671 = vmatmul.mubr.msk.bf16.vlgmr.msra.gmra.mrb[0].mxu0 %vm680_vm3, %v978_v27  ;;  %v1100_v27 = vld [vmem:[%s4937_s11 + $0x60] sm:$0xff] }
 0x524   : > { %1440 = vmatprep.mubr.bf16.mxu0 %v3999_v62  ;;  %1409 = vmatpush1.bf16.msra.mxu0 %v3283_v47 }
 0x525   : > { %1410 = vmatprep.subr.bf16.mxu0 %v3300_v57  ;;  %v3310_v57 = vcombine.high %v1110_v51, %v1118_v52 }
 0x528   : > { %1411 = vmatpush1.bf16.msra.mxu0 %v3299_v56  ;;  %v3295_v56 = vcombine.low %v1095_v45, %v1103_v46 }
 0x529   : > { %1490 = vmatprep.subr.bf16.mxu0 %v3288_v3  ;;  %v3766_v3 = vld [vmem:[%s4939_s13 + $0x48] sm:$0xff]  }
 0x5f6   : > { %v1033_v29 = vpop.f32.mrb[0].mxu0 }
 0x5f7   : > { %v1040_v31 = vadd.f32 %v1039_v28, %v1033_v29  ;;  %v3672_v32 = vpop.f32.mrb[1].mxu0  ;;  %v1093_v28 = vld [vmem:[%s4937_s11 + $0x28] sm:$0xff] }
 0x5f8   : > { %v1036_v33 = vpop.f32.mrb[2].mxu0  ;;  %v1101_v29 = vld [vmem:[%s4937_s11 + $0x68] sm:$0xff]  ;;  %v3290_v32 = vcombine.high %v1092_v26, %v1100_v27 }
 0x5f9   : > { %v4266_v34 = vadd.f32 %v3278_v30, %v1040_v31  ;;  %v3673_v35 = vpop.f32.mrb[3].mxu0  ;;  %v3301_v30 = vcombine.low %v1106_v17, %v1114_v18  ;;  %v3303_v31 = vcombine.low %v1107_v19, %v1115_v20  ;;  %v3292_v33 = vcombine.high %v1093_v28, %v1101_v29  ;;  %v3781_v17 = vld [vmem:[%s4939_s13 + $0xa0] sm:$0xff]   ;;  %v3782_v18 = vld [vmem:[%s4939_s13 + $0x68] sm:$0xff]  }
 0x5fa   : > { %v1108_v35 = vld [vmem:[%s4937_s11 + $0xa0] sm:$0xff]  ;;  %v3783_v19 = vld [vmem:[%s4939_s13 + $0xe8] sm:$0xff]  }
 0x5fb   : > { %v1051_v36 = vsel %vm680_vm3, %v4266_v34, 0.0  ;;  %v3784_v20 = vld [vmem:[%s4939_s13 + $0x28] sm:$0xff]  }
 0x5fc   : > { %1052 = vadd.xlane.f32.xlu1 %v1051_v36  ;;  %v1116_v36 = vld [vmem:[%s4937_s11 + $0xe0] sm:$0xff] }
 0x5fd   : > { %v3305_v47 = vcombine.low %v1108_v35, %v1116_v36 }
 0x689   : > { %v1053_v37 = vpop.xlane.xlu1 %1052 }
 0x68a   : > { %v1055_v38 = vmul.f32 0.03125, %v1053_v37  ;;  %v1109_v37 = vld [vmem:[%s4937_s11 + $0xa8] sm:$0xff] }
 0x68c   : > { %v1056_v39 = vsub.f32 %v4266_v34, %v1055_v38  ;;  %v1117_v38 = vld [vmem:[%s4937_s11 + $0xe8] sm:$0xff] }
 0x68d   : > { %v3308_v42 = vcombine.high %v1109_v37, %v1117_v38  ;;  %v3307_v48 = vcombine.low %v1109_v37, %v1117_v38  ;;  %v1134_v37 = vsub.s32 2, %v4222_v23  ;;  %v4515_v38 = vld [vmem:[%s4973_s30] sm:$0xff] }
 0x68e   : > { %v1057_v40 = vmul.f32 %v1056_v39, %v1056_v39  ;;  %v1069_v13 = vmul.f32 %v3279_v12, %v1056_v39  ;;  %v3289_v39 = vcombine.low %v1092_v26, %v1100_v27  ;;  %v3776_v12 = vld [vmem:[%s4939_s13 + $0x18] sm:$0xff]   ;;  %v3789_v26 = vld [vmem:[%s4939_s13 + $0xb0] sm:$0xff]  }
 0x68f   : > { %v3790_v27 = vld [vmem:[%s4939_s13 + $0x78] sm:$0xff]  }
 0x690   : > { %v1058_v41 = vsel %vm680_vm3, %v1057_v40, 0.0  ;;  %v3291_v40 = vcombine.low %v1093_v28, %v1101_v29  ;;  %v3791_v28 = vld [vmem:[%s4939_s13 + $0xf8] sm:$0xff]  }
 0x691   : > { %1059 = vadd.xlane.f32.xlu0 %v1058_v41  ;;  %v3306_v41 = vcombine.high %v1108_v35, %v1116_v36  ;;  %v3792_v29 = vld [vmem:[%s4939_s13 + $0x38] sm:$0xff]   ;;  %v4504_v35 = vld [vmem:[%s4973_s30 + $0x8] sm:$0xff] }
 0x71e   : > { %v1060_v4 = vpop.xlane.xlu0 %1059 }
 0x71f   : > { %v1062_v5 = vmul.f32 0.032258064, %v1060_v4  ;;  %v3768_v4 = vld [vmem:[%s4939_s13 + $0x8] sm:$0xff]  }
 0x721   : > { %3898 = vrsqrt.f32 %v1062_v5  ;;  %vm1072_vm11 = vcmp.eq.f32.partialorder %v1062_v5, inf  ;;  %v1075_v8 = vand.u32 2147483648, %v1062_v5  ;;  %vm1074_vm12 = vcmp.eq.f32.partialorder %v1062_v5, 0.0 }
 0x72b   : > { %v3899_v6 = vpop.eup %3898 }
 0x72c   : > { %v1071_v7 = vmul.f32 %v3899_v6, %v1062_v5  ;;  %v3770_v6 = vld [vmem:[%s4939_s13 + $0x50] sm:$0xff]  }
 0x72e   : > { %v1073_v9 = vsel %vm1072_vm11, %v1062_v5, %v1071_v7  ;;  %v3769_v5 = vld [vmem:[%s4939_s13 + $0x88] sm:$0xff]   ;;  %v3771_v7 = vld [vmem:[%s4939_s13 + $0xd0] sm:$0xff]  }
 0x72f   : > { %v1076_v10 = vsel %vm1074_vm12, %v1075_v8, %v1073_v9  ;;  %v3772_v8 = vld [vmem:[%s4939_s13 + $0x10] sm:$0xff]  }
 0x730   : > { %v1077_v11 = vadd.f32 1e-06, %v1076_v10  ;;  %v3773_v9 = vld [vmem:[%s4939_s13 + $0x90] sm:$0xff]   ;;  %v3774_v10 = vld [vmem:[%s4939_s13 + $0x58] sm:$0xff]  }
 0x732   : > { %3900 = vrcp.f32 %v1077_v11  ;;  %v3775_v11 = vld [vmem:[%s4939_s13 + $0xd8] sm:$0xff]  }
 0x73c   : > { %v3901_v14 = vpop.eup %3900 }
 0x73d   : > { %v1079_v16 = vmul.f32 %v3901_v14, %v1069_v13  ;;  %v3777_v13 = vld [vmem:[%s4939_s13 + $0x98] sm:$0xff]   ;;  %v3778_v14 = vld [vmem:[%s4939_s13 + $0x60] sm:$0xff]  }
 0x73f   : > { %v1086_v21 = vadd.f32 %v3280_v15, %v1079_v16  ;;  %v3779_v15 = vld [vmem:[%s4939_s13 + $0xe0] sm:$0xff]  }
 0x740   : > { %v3780_v16 = vld [vmem:[%s4939_s13 + $0x20] sm:$0xff]  }
 0x741   : > { %v4326_v22 = vpack.c.bf16 %v1086_v21, %v1086_v21  ;;  %v3785_v21 = vld [vmem:[%s4939_s13 + $0xa8] sm:$0xff]  }
 0x743   : > { %3313 = vmatmul.mubr.msk.bf16.vlgmr.msra.gmra.mrb[0].mxu1 %vm680_vm3, %v4326_v22  ;;  %3314 = vmatmul.mubr.msk.bf16.vlgmr.msra.gmra.mrb[4].mxu0 %vm680_vm3, %v4326_v22 }
 0x744   : > { %1450 = vmatpush1.bf16.msra.mxu1 %v3285_v0  ;;  %1491 = vmatpush1.bf16.msra.mxu0 %v3287_v1  ;;  %v3764_v0 = vld [vmem:[%s4939_s13] sm:$0xff]  }
 0x745   : > { %1451 = vmatprep.subr.bf16.mxu1 %v3302_v2  ;;  %1492 = vmatprep.subr.bf16.mxu0 %v3304_v25  ;;  %v3765_v1 = vld [vmem:[%s4939_s13 + $0x80] sm:$0xff]   ;;  %v3787_v2 = vld [vmem:[%s4939_s13 + $0xf0] sm:$0xff]  }
 0x746   : > { %1481 = vmatprep.mubr.bf16.mxu1 %v3999_v62  ;;  %1522 = vmatprep.mubr.bf16.mxu0 %v3999_v62  ;;  %v3788_v25 = vld [vmem:[%s4939_s13 + $0x30] sm:$0xff]  }
 0x748   : > { %1452 = vmatpush1.bf16.msra.mxu1 %v3301_v30  ;;  %1493 = vmatpush1.bf16.msra.mxu0 %v3303_v31  ;;  %v3793_v30 = vld [vmem:[%s4939_s13 + $0xb8] sm:$0xff]   ;;  %v3794_v31 = vld [vmem:[%s4939_s13 + $0x140] sm:$0xff]  }
 0x749   : > { %1531 = vmatprep.subr.bf16.mxu1 %v3290_v32  ;;  %1572 = vmatprep.subr.bf16.mxu0 %v3292_v33  ;;  %v3795_v32 = vld [vmem:[%s4939_s13 + $0x1c0] sm:$0xff]   ;;  %v1150_v33 = vsub.s32 6, %v4222_v23 }
 0x74b   : > { %3315 = vmatmul.mubr.msk.bf16.vlgmr.msra.gmra.mrb[4].mxu1 %vm680_vm3, %v4326_v22  ;;  %3316 = vmatmul.mubr.msk.bf16.vlgmr.msra.gmra.mrb[8].mxu0 %vm680_vm3, %v4326_v22  ;;  %v4509_v36 = vrot.slane %v4504_v35, %v1150_v33 }
 0x74c   : > { %1532 = vmatpush1.bf16.msra.mxu1 %v3289_v39  ;;  %1573 = vmatpush1.bf16.msra.mxu0 %v3291_v40  ;;  %v1130_v39 = vsub.s32 1, %v4222_v23  ;;  %v1138_v40 = vsub.s32 3, %v4222_v23 }
 0x74d   : > { %1533 = vmatprep.subr.bf16.mxu1 %v3306_v41  ;;  %1574 = vmatprep.subr.bf16.mxu0 %v3308_v42  ;;  %v1127_v41 = vrot.slane %v4515_v38, %v4225_v24  ;;  %v1135_v42 = vrot.slane %v4515_v38, %v1134_v37 }
 0x74e   : > { %1563 = vmatprep.mubr.bf16.mxu1 %v3999_v62  ;;  %1604 = vmatprep.mubr.bf16.mxu0 %v3999_v62  ;;  %v1131_v43 = vrot.slane %v4515_v38, %v1130_v39  ;;  %v1139_v44 = vrot.slane %v4515_v38, %v1138_v40 }
 0x750   : > { %1534 = vmatpush1.bf16.msra.mxu1 %v3305_v47  ;;  %1575 = vmatpush1.bf16.msra.mxu0 %v3307_v48 }
 0x751   : > { %1613 = vmatprep.subr.bf16.mxu1 %v3294_v49  ;;  %1654 = vmatprep.subr.bf16.mxu0 %v3296_v50 }
 0x753   : > { %3317 = vmatmul.mubr.msk.bf16.vlgmr.msra.gmra.mrb[8].mxu1 %vm680_vm3, %v4326_v22  ;;  %3318 = vmatmul.mubr.msk.bf16.vlgmr.msra.gmra.mrb[12].mxu0 %vm680_vm3, %v4326_v22 }
 0x754   : > { %1614 = vmatpush1.bf16.msra.mxu1 %v3293_v55  ;;  %1655 = vmatpush1.bf16.msra.mxu0 %v3295_v56  ;;  %v1146_v55 = vsub.s32 5, %v4222_v23  ;;  %v1154_v56 = vsub.s32 7, %v4222_v23 }
 0x755   : > { %1615 = vmatprep.subr.bf16.mxu1 %v3310_v57  ;;  %1656 = vmatprep.subr.bf16.mxu0 %v3312_v58 }
 0x756   : > { %1645 = vmatprep.mubr.bf16.mxu1 %v3999_v62  ;;  %1686 = vmatprep.mubr.bf16.mxu0 %v3999_v62  ;;  %v3767_v62 = vld [vmem:[%s4939_s13 + $0xc8] sm:$0xff]  }
 0x758   : > { %1616 = vmatpush1.bf16.msra.mxu1 %v3309_v59  ;;  %1657 = vmatpush1.bf16.msra.mxu0 %v3311_v60 }
 0x759   : > { %3470 = vmatprep.subr.bf16.mxu1 %v3762_v61  ;;  %3492 = vmatprep.subr.bf16.mxu0 %v3763_v63 }
 0x75b   : > { %3319 = vmatmul.mubr.msk.bf16.vlgmr.msra.gmra.mrb[12].mxu1 %vm680_vm3, %v4326_v22  ;;  %3320 = vmatmul.mubr.msk.bf16.vlgmr.msra.gmra.mrb[16].mxu0 %vm680_vm3, %v4326_v22  ;;  %v3786_v22 = vld [vmem:[%s4939_s13 + $0x70] sm:$0xff]  }
 0x75c   : > { %3471 = vmatpush3.bf16.msra.mxu1 %v3764_v0  ;;  %3493 = vmatpush3.bf16.msra.mxu0 %v3765_v1 }
 0x75d   : > { %3472 = vmatprep.subr.bf16.mxu1 %v3766_v3  ;;  %3494 = vmatprep.subr.bf16.mxu0 %v3767_v62  ;;  %v1147_v3 = vrot.slane %v4515_v38, %v1146_v55  ;;  %v1155_v62 = vrot.slane %v4515_v38, %v1154_v56 }
 0x760   : > { %3473 = vmatpush3.bf16.msra.mxu1 %v3768_v4  ;;  %3495 = vmatpush3.bf16.msra.mxu0 %v3769_v5  ;;  %v3796_v4 = vld [vmem:[%s4939_s13 + $0x100] sm:$0xff]  }
 0x761   : > { %3474 = vmatprep.subr.bf16.mxu1 %v3770_v6  ;;  %3496 = vmatprep.subr.bf16.mxu0 %v3771_v7  ;;  %v3797_v5 = vld [vmem:[%s4939_s13 + $0x180] sm:$0xff]  }
 0x764   : > { %3475 = vmatpush3.bf16.msra.mxu1 %v3772_v8  ;;  %3497 = vmatpush3.bf16.msra.mxu0 %v3773_v9  ;;  %v3798_v8 = vld [vmem:[%s4939_s13 + $0x148] sm:$0xff]  }
 0x765   : > { %3476 = vmatprep.subr.bf16.mxu1 %v3774_v10  ;;  %3498 = vmatprep.subr.bf16.mxu0 %v3775_v11  ;;  %v3799_v9 = vld [vmem:[%s4939_s13 + $0x1c8] sm:$0xff]  }
 0x768   : > { %3477 = vmatpush3.bf16.msra.mxu1 %v3776_v12  ;;  %3499 = vmatpush3.bf16.msra.mxu0 %v3777_v13 }
 0x769   : > { %3478 = vmatprep.subr.bf16.mxu1 %v3778_v14  ;;  %3500 = vmatprep.subr.bf16.mxu0 %v3779_v15 }
 0x76c   : > { %3479 = vmatpush3.bf16.msra.mxu1 %v3780_v16  ;;  %3501 = vmatpush3.bf16.msra.mxu0 %v3781_v17 }
 0x76d   : > { %3480 = vmatprep.subr.bf16.mxu1 %v3782_v18  ;;  %3502 = vmatprep.subr.bf16.mxu0 %v3783_v19  ;;  %v3800_v18 = vld [vmem:[%s4939_s13 + $0x108] sm:$0xff]  }
 0x76e   : > { %v3801_v19 = vld [vmem:[%s4939_s13 + $0x188] sm:$0xff]  }
 0x770   : > { %3481 = vmatpush3.bf16.msra.mxu1 %v3784_v20  ;;  %3503 = vmatpush3.bf16.msra.mxu0 %v3785_v21 }
 0x771   : > { %3482 = vmatprep.subr.bf16.mxu1 %v3786_v22  ;;  %3504 = vmatprep.subr.bf16.mxu0 %v3787_v2  ;;  %v3802_v22 = vld [vmem:[%s4939_s13 + $0x150] sm:$0xff]  }
 0x772   : > { %v3803_v2 = vld [vmem:[%s4939_s13 + $0x1d0] sm:$0xff]  }
 0x774   : > { %3483 = vmatpush3.bf16.msra.mxu1 %v3788_v25  ;;  %3505 = vmatpush3.bf16.msra.mxu0 %v3789_v26 }
 0x775   : > { %3484 = vmatprep.subr.bf16.mxu1 %v3790_v27  ;;  %3506 = vmatprep.subr.bf16.mxu0 %v3791_v28  ;;  %v1167_v27 = vrot.slane %v4504_v35, %v1134_v37  ;;  %v3807_v37 = vld [vmem:[%s4939_s13 + $0x1d8] sm:$0xff]  }
 0x778   : > { %3485 = vmatpush3.bf16.msra.mxu1 %v3792_v29  ;;  %3507 = vmatpush3.bf16.msra.mxu0 %v3793_v30  ;;  %v3804_v30 = vld [vmem:[%s4939_s13 + $0x110] sm:$0xff]  }
 0x779   : > { %3514 = vmatprep.subr.bf16.mxu1 %v3794_v31  ;;  %3536 = vmatprep.subr.bf16.mxu0 %v3795_v32  ;;  %v3805_v31 = vld [vmem:[%s4939_s13 + $0x190] sm:$0xff]   ;;  %v3806_v32 = vld [vmem:[%s4939_s13 + $0x158] sm:$0xff]  }
 0x816   : > { %v1401_v45 = vpop.f32.mrb[0].mxu1  ;;  %v1442_v46 = vpop.f32.mrb[4].mxu0 }
 0x817   : > { %v1402_v47 = vadd.f32 %v1401_v45, %v1127_v41  ;;  %v1443_v48 = vadd.f32 %v1442_v46, %v1135_v42  ;;  %v1403_v49 = vpop.f32.mrb[1].mxu1  ;;  %v1444_v50 = vpop.f32.mrb[5].mxu0 }
 0x818   : > { %v1404_v51 = vadd.f32 %v1403_v49, %v1131_v43  ;;  %v1445_v52 = vadd.f32 %v1444_v50, %v1139_v44  ;;  %v1405_v53 = vpop.f32.mrb[2].mxu1  ;;  %v1446_v54 = vpop.f32.mrb[6].mxu0  ;;  %v3809_v49 = vld [vmem:[%s4939_s13 + $0x198] sm:$0xff]   ;;  %v1142_v50 = vsub.s32 4, %v4222_v23 }
 0x819   : > { %v1695_v57 = vmax.f32 %v1402_v47, 0.0  ;;  %v1697_v58 = vmax.f32 %v1443_v48, 0.0  ;;  %v1406_v59 = vpop.f32.mrb[3].mxu1  ;;  %v1447_v60 = vpop.f32.mrb[7].mxu0  ;;  %v3808_v48 = vld [vmem:[%s4939_s13 + $0x118] sm:$0xff]   ;;  %v3810_v53 = vld [vmem:[%s4939_s13 + $0x160] sm:$0xff]  }
 0x81a   : > { %v1696_v61 = vmax.f32 %v1404_v51, 0.0  ;;  %v1698_v63 = vmax.f32 %v1445_v52, 0.0  ;;  %v3811_v54 = vld [vmem:[%s4939_s13 + $0x1e0] sm:$0xff]   ;;  %v3814_v60 = vld [vmem:[%s4939_s13 + $0x168] sm:$0xff]   ;;  %v3855_v23 = vld [vmem:[%s4939_s13 + $0x2f8] sm:$0xff]  }
 0x81b   : > { %v1711_v6 = vpack.c.bf16 %v1695_v57, %v1695_v57  ;;  %v1713_v7 = vpack.c.bf16 %v1697_v58, %v1697_v58  ;;  %v1175_v57 = vrot.slane %v4504_v35, %v1142_v50  ;;  %v3812_v58 = vld [vmem:[%s4939_s13 + $0x120] sm:$0xff]  }
 0x81c   : > { %v1712_v0 = vpack.c.bf16 %v1696_v61, %v1696_v61  ;;  %v1714_v1 = vpack.c.bf16 %v1698_v63, %v1698_v63  ;;  %v3813_v59 = vld [vmem:[%s4939_s13 + $0x1a0] sm:$0xff]   ;;  %v3815_v61 = vld [vmem:[%s4939_s13 + $0x1e8] sm:$0xff]  }
 0x81e   : > { %v4548_v10 = vpop.f32.mrb[4].mxu1  ;;  %v4550_v11 = vpop.f32.mrb[8].mxu0  ;;  %2790 = vmatprep.mubr.bf16.mxu1 %v1712_v0  ;;  %2830 = vmatprep.mubr.bf16.mxu0 %v1714_v1 }
 0x81f   : > { %v1485_v12 = vpop.f32.mrb[5].mxu1  ;;  %v1526_v13 = vpop.f32.mrb[9].mxu0  ;;  %2791 = vmatmul.mubr.bf16.vlgmr.msra.gmra.mrb[16].mxu1 %v1711_v6  ;;  %2831 = vmatmul.mubr.bf16.vlgmr.msra.gmra.mrb[20].mxu0 %v1713_v7  ;;  %v3816_v7 = vld [vmem:[%s4939_s13 + $0x128] sm:$0xff]  }
 0x820   : > { %v1486_v14 = vadd.f32 %v1485_v12, %v1147_v3  ;;  %v1527_v15 = vadd.f32 %v1526_v13, %v1155_v62  ;;  %3515 = vmatpush3.bf16.msra.mxu1 %v3796_v4  ;;  %3537 = vmatpush3.bf16.msra.mxu0 %v3797_v5  ;;  %v1487_v16 = vpop.f32.mrb[6].mxu1  ;;  %v1528_v17 = vpop.f32.mrb[10].mxu0 }
 0x821   : > { %v1488_v20 = vpop.f32.mrb[7].mxu1  ;;  %v1529_v21 = vpop.f32.mrb[11].mxu0  ;;  %3516 = vmatprep.subr.bf16.mxu1 %v3798_v8  ;;  %3538 = vmatprep.subr.bf16.mxu0 %v3799_v9  ;;  %v3817_v8 = vld [vmem:[%s4939_s13 + $0x1a8] sm:$0xff]   ;;  %v1143_v9 = vrot.slane %v4515_v38, %v1142_v50  ;;  %v1163_v16 = vrot.slane %v4504_v35, %v1130_v39  ;;  %v3821_v17 = vld [vmem:[%s4939_s13 + $0x1b0] sm:$0xff]   ;;  %v3822_v39 = vld [vmem:[%s4939_s13 + $0x178] sm:$0xff]  }
 0x822   : > { %v1700_v25 = vmax.f32 %v1486_v14, 0.0  ;;  %v1702_v26 = vmax.f32 %v1527_v15, 0.0  ;;  %v3818_v14 = vld [vmem:[%s4939_s13 + $0x170] sm:$0xff]  }
 0x823   : > { %v3819_v15 = vld [vmem:[%s4939_s13 + $0x1f0] sm:$0xff]  }
 0x824   : > { %v1716_v28 = vpack.c.bf16 %v1700_v25, %v1700_v25  ;;  %v1718_v29 = vpack.c.bf16 %v1702_v26, %v1702_v26  ;;  %3517 = vmatpush3.bf16.msra.mxu1 %v3800_v18  ;;  %3539 = vmatpush3.bf16.msra.mxu0 %v3801_v19  ;;  %v1484_v18 = vadd.f32 %v4548_v10, %v1143_v9  ;;  %v3824_v10 = vld [vmem:[%s4939_s13 + $0x138] sm:$0xff]   ;;  %v3826_v25 = vld [vmem:[%s4939_s13 + $0x240] sm:$0xff]   ;;  %v3836_v50 = vld [vmem:[%s4939_s13 + $0x210] sm:$0xff]  }
 0x825   : > { %3518 = vmatprep.subr.bf16.mxu1 %v3802_v22  ;;  %3540 = vmatprep.subr.bf16.mxu0 %v3803_v2  ;;  %v3827_v26 = vld [vmem:[%s4939_s13 + $0x2c0] sm:$0xff]   ;;  %v3851_v9 = vld [vmem:[%s4939_s13 + $0x2f0] sm:$0xff]  }
 0x826   : > { %v4577_v41 = vpop.f32.mrb[8].mxu1  ;;  %v1606_v42 = vpop.f32.mrb[12].mxu0  ;;  %2870 = vmatprep.mubr.bf16.mxu1 %v1716_v28  ;;  %2910 = vmatprep.mubr.bf16.mxu0 %v1718_v29  ;;  %v1699_v22 = vmax.f32 %v1484_v18, 0.0  ;;  %v3828_v29 = vld [vmem:[%s4939_s13 + $0x200] sm:$0xff]  }
 0x827   : > { %v4579_v43 = vadd.f32 %v1606_v42, %v1167_v27  ;;  %v1567_v44 = vpop.f32.mrb[9].mxu1  ;;  %v1608_v45 = vpop.f32.mrb[13].mxu0  ;;  %v3830_v42 = vld [vmem:[%s4939_s13 + $0x248] sm:$0xff]   ;;  %v3860_v18 = vld [vmem:[%s4939_s13 + $0x300] sm:$0xff]  }
 0x828   : > { %3519 = vmatpush3.bf16.msra.mxu1 %v3804_v30  ;;  %3541 = vmatpush3.bf16.msra.mxu0 %v3805_v31  ;;  %v1569_v46 = vpop.f32.mrb[10].mxu1  ;;  %v1610_v47 = vpop.f32.mrb[14].mxu0  ;;  %v1568_v20 = vadd.f32 %v1567_v44, %v1163_v16  ;;  %v1715_v30 = vpack.c.bf16 %v1699_v22, %v1699_v22  ;;  %v3831_v44 = vld [vmem:[%s4939_s13 + $0x2c8] sm:$0xff]   ;;  %v3857_v16 = vld [vmem:[%s4939_s13 + $0x2b8] sm:$0xff]  }
 0x829   : > { %v1570_v51 = vpop.f32.mrb[11].mxu1  ;;  %v1611_v52 = vpop.f32.mrb[15].mxu0  ;;  %3520 = vmatprep.subr.bf16.mxu1 %v3806_v32  ;;  %3542 = vmatprep.subr.bf16.mxu0 %v3807_v37  ;;  %v3829_v32 = vld [vmem:[%s4939_s13 + $0x280] sm:$0xff]   ;;  %v3832_v46 = vld [vmem:[%s4939_s13 + $0x208] sm:$0xff]  }
 0x82a   : > { %v1704_v27 = vmax.f32 %v1568_v20, 0.0  ;;  %v3833_v47 = vld [vmem:[%s4939_s13 + $0x288] sm:$0xff]   ;;  %v3837_v51 = vld [vmem:[%s4939_s13 + $0x290] sm:$0xff]   ;;  %v3838_v52 = vld [vmem:[%s4939_s13 + $0x258] sm:$0xff]  }
 0x82b   : > { %v3865_v22 = vld [vmem:[%s4939_s13 + $0x388] sm:$0xff]  }
 0x82c   : > { %3521 = vmatpush3.bf16.msra.mxu1 %v3808_v48  ;;  %3543 = vmatpush3.bf16.msra.mxu0 %v3809_v49  ;;  %v1720_v37 = vpack.c.bf16 %v1704_v27, %v1704_v27  ;;  %v3834_v48 = vld [vmem:[%s4939_s13 + $0x250] sm:$0xff]  }
 0x82d   : > { %3522 = vmatprep.subr.bf16.mxu1 %v3810_v53  ;;  %3544 = vmatprep.subr.bf16.mxu0 %v3811_v54  ;;  %v3835_v49 = vld [vmem:[%s4939_s13 + $0x2d0] sm:$0xff]   ;;  %v3839_v53 = vld [vmem:[%s4939_s13 + $0x2d8] sm:$0xff]  }
 0x82e   : > { %v1647_v63 = vpop.f32.mrb[12].mxu1  ;;  %v1688_v0 = vpop.f32.mrb[16].mxu0  ;;  %v3840_v54 = vld [vmem:[%s4939_s13 + $0x218] sm:$0xff]   ;;  %v3869_v27 = vld [vmem:[%s4939_s13 + $0x390] sm:$0xff]  }
 0x82f   : > { %v4607_v1 = vadd.f32 %v1647_v63, %v1175_v57  ;;  %v4610_v3 = vadd.f32 %v1688_v0, %v4509_v36  ;;  %v4612_v62 = vpop.f32.mrb[13].mxu1  ;;  %v4614_v4 = vpop.f32.mrb[17].mxu0  ;;  %v1151_v36 = vrot.slane %v4515_v38, %v1150_v33  ;;  %v1171_v33 = vrot.slane %v4504_v35, %v1138_v40  ;;  %v3820_v38 = vld [vmem:[%s4939_s13 + $0x130] sm:$0xff]   ;;  %v3823_v40 = vld [vmem:[%s4939_s13 + $0x1f8] sm:$0xff]   ;;  %v3846_v63 = vld [vmem:[%s4939_s13 + $0x268] sm:$0xff]  }
 0x830   : > { %3523 = vmatpush3.bf16.msra.mxu1 %v3812_v58  ;;  %3545 = vmatpush3.bf16.msra.mxu0 %v3813_v59  ;;  %v1651_v5 = vpop.f32.mrb[14].mxu1  ;;  %v1692_v6 = vpop.f32.mrb[18].mxu0  ;;  %v3841_v57 = vld [vmem:[%s4939_s13 + $0x298] sm:$0xff]   ;;  %v3842_v58 = vld [vmem:[%s4939_s13 + $0x260] sm:$0xff]   ;;  %v3847_v0 = vld [vmem:[%s4939_s13 + $0x2e8] sm:$0xff]  }
 0x831   : > { %v1652_v12 = vpop.f32.mrb[15].mxu1  ;;  %v1693_v13 = vpop.f32.mrb[19].mxu0  ;;  %3524 = vmatprep.subr.bf16.mxu1 %v3814_v60  ;;  %3546 = vmatprep.subr.bf16.mxu0 %v3815_v61  ;;  %v1525_v19 = vadd.f32 %v4550_v11, %v1151_v36  ;;  %v1609_v21 = vadd.f32 %v1608_v45, %v1171_v33  ;;  %v3825_v11 = vld [vmem:[%s4939_s13 + $0x1b8] sm:$0xff]   ;;  %v3843_v59 = vld [vmem:[%s4939_s13 + $0x2e0] sm:$0xff]   ;;  %v3848_v5 = vld [vmem:[%s4939_s13 + $0x228] sm:$0xff]   ;;  %v1159_v6 = vrot.slane %v4504_v35, %v4225_v24 }
 0x832   : > { %v3844_v60 = vld [vmem:[%s4939_s13 + $0x220] sm:$0xff]   ;;  %v1179_v36 = vrot.slane %v4504_v35, %v1146_v55  ;;  %v1187_v24 = vrot.slane %v4504_v35, %v1154_v56  ;;  %v3852_v12 = vld [vmem:[%s4939_s13 + $0x230] sm:$0xff]   ;;  %v3854_v55 = vld [vmem:[%s4939_s13 + $0x278] sm:$0xff]  }
 0x833   : > { %v1701_v2 = vmax.f32 %v1525_v19, 0.0  ;;  %v1706_v28 = vmax.f32 %v1609_v21, 0.0  ;;  %v3845_v61 = vld [vmem:[%s4939_s13 + $0x2a0] sm:$0xff]   ;;  %v1566_v13 = vadd.f32 %v4577_v41, %v1159_v6  ;;  %v3856_v41 = vld [vmem:[%s4939_s13 + $0x238] sm:$0xff]   ;;  %v3863_v21 = vld [vmem:[%s4939_s13 + $0x3c8] sm:$0xff]  }
 0x834   : > { %3525 = vmatpush3.bf16.msra.mxu1 %v3816_v7  ;;  %3547 = vmatpush3.bf16.msra.mxu0 %v3817_v8  ;;  %v3849_v7 = vld [vmem:[%s4939_s13 + $0x2a8] sm:$0xff]   ;;  %v3850_v8 = vld [vmem:[%s4939_s13 + $0x270] sm:$0xff]   ;;  %v1650_v35 = vadd.f32 %v4612_v62, %v1179_v36  ;;  %v1691_v56 = vadd.f32 %v4614_v4, %v1187_v24  ;;  %v3858_v33 = vld [vmem:[%s4939_s13 + $0x340] sm:$0xff]   ;;  %v1705_v62 = vmax.f32 %v4579_v43, 0.0 }
 0x835   : > { %3526 = vmatprep.subr.bf16.mxu1 %v3818_v14  ;;  %3548 = vmatprep.subr.bf16.mxu0 %v3819_v15  ;;  %v1717_v31 = vpack.c.bf16 %v1701_v2, %v1701_v2  ;;  %v1722_v45 = vpack.c.bf16 %v1706_v28, %v1706_v28  ;;  %v3853_v14 = vld [vmem:[%s4939_s13 + $0x2b0] sm:$0xff]   ;;  %v1703_v15 = vmax.f32 %v1566_v13, 0.0  ;;  %v3859_v4 = vld [vmem:[%s4939_s13 + $0x3c0] sm:$0xff]   ;;  %v3870_v28 = vld [vmem:[%s4939_s13 + $0x358] sm:$0xff]  }
 0x836   : > { %v1721_v43 = vpack.c.bf16 %v1705_v62, %v1705_v62  ;;  %v3866_v2 = vld [vmem:[%s4939_s13 + $0x350] sm:$0xff]  }
 0x837   : > { %v1719_v19 = vpack.c.bf16 %v1703_v15, %v1703_v15 }
 0x838   : > { %3527 = vmatpush3.bf16.msra.mxu1 %v3820_v38  ;;  %3549 = vmatpush3.bf16.msra.mxu0 %v3821_v17  ;;  %v1708_v38 = vmax.f32 %v1650_v35, 0.0  ;;  %v1710_v17 = vmax.f32 %v1691_v56, 0.0 }
 0x839   : > { %3528 = vmatprep.subr.bf16.mxu1 %v3822_v39  ;;  %3550 = vmatprep.subr.bf16.mxu0 %v3823_v40  ;;  %v3861_v39 = vld [vmem:[%s4939_s13 + $0x380] sm:$0xff]   ;;  %v3862_v40 = vld [vmem:[%s4939_s13 + $0x348] sm:$0xff]  }
 0x83a   : > { %v1724_v20 = vpack.c.bf16 %v1708_v38, %v1708_v38 }
 0x83c   : > { %3529 = vmatpush3.bf16.msra.mxu1 %v3824_v10  ;;  %3551 = vmatpush3.bf16.msra.mxu0 %v3825_v11  ;;  %v1726_v10 = vpack.c.bf16 %v1710_v17, %v1710_v17  ;;  %v3864_v11 = vld [vmem:[%s4939_s13 + $0x308] sm:$0xff]  }
 0x83d   : > { %3558 = vmatprep.subr.bf16.mxu1 %v3826_v25  ;;  %3580 = vmatprep.subr.bf16.mxu0 %v3827_v26  ;;  %v3867_v25 = vld [vmem:[%s4939_s13 + $0x3d0] sm:$0xff]  }
 0x83e   : > { %v3868_v26 = vld [vmem:[%s4939_s13 + $0x310] sm:$0xff]  }
 0x83f   : > { %2871 = vmatmul.mubr.bf16.vlgmr.msra.gmra.mrb[20].mxu1 %v1715_v30  ;;  %2911 = vmatmul.mubr.bf16.vlgmr.msra.gmra.mrb[24].mxu0 %v1717_v31  ;;  %v3872_v30 = vld [vmem:[%s4939_s13 + $0x318] sm:$0xff]  }
 0x840   : > { %3559 = vmatpush3.bf16.msra.mxu1 %v3828_v29  ;;  %2950 = vmatprep.mubr.bf16.mxu1 %v1720_v37  ;;  %v3871_v29 = vld [vmem:[%s4939_s13 + $0x3d8] sm:$0xff]   ;;  %v3875_v37 = vld [vmem:[%s4939_s13 + $0x3e0] sm:$0xff]  }
 0x841   : > { %3581 = vmatpush3.bf16.msra.mxu0 %v3829_v32  ;;  %2990 = vmatprep.mubr.bf16.mxu0 %v1722_v45  ;;  %v3873_v31 = vld [vmem:[%s4939_s13 + $0x398] sm:$0xff]   ;;  %v3874_v32 = vld [vmem:[%s4939_s13 + $0x360] sm:$0xff]   ;;  %v3878_v45 = vld [vmem:[%s4939_s13 + $0x368] sm:$0xff]  }
 0x842   : > { %3560 = vmatprep.subr.bf16.mxu1 %v3830_v42  ;;  %3582 = vmatprep.subr.bf16.mxu0 %v3831_v44  ;;  %v3876_v42 = vld [vmem:[%s4939_s13 + $0x320] sm:$0xff]  }
 0x843   : > { %v3877_v44 = vld [vmem:[%s4939_s13 + $0x3a0] sm:$0xff]  }
 0x844   : > { %3561 = vmatpush3.bf16.msra.mxu1 %v3832_v46  ;;  %v3879_v46 = vld [vmem:[%s4939_s13 + $0x3e8] sm:$0xff]  }
 0x845   : > { %3583 = vmatpush3.bf16.msra.mxu0 %v3833_v47  ;;  %3562 = vmatprep.subr.bf16.mxu1 %v3834_v48  ;;  %v3880_v47 = vld [vmem:[%s4939_s13 + $0x328] sm:$0xff]  }
 0x846   : > { %3584 = vmatprep.subr.bf16.mxu0 %v3835_v49  ;;  %v3881_v48 = vld [vmem:[%s4939_s13 + $0x3a8] sm:$0xff]   ;;  %v3882_v49 = vld [vmem:[%s4939_s13 + $0x370] sm:$0xff]  }
 0x848   : > { %3563 = vmatpush3.bf16.msra.mxu1 %v3836_v50  ;;  %v3883_v50 = vld [vmem:[%s4939_s13 + $0x3f0] sm:$0xff]  }
 0x849   : > { %3585 = vmatpush3.bf16.msra.mxu0 %v3837_v51  ;;  %3564 = vmatprep.subr.bf16.mxu1 %v3838_v52  ;;  %v3884_v51 = vld [vmem:[%s4939_s13 + $0x330] sm:$0xff]  }
 0x84a   : > { %3586 = vmatprep.subr.bf16.mxu0 %v3839_v53  ;;  %v3885_v52 = vld [vmem:[%s4939_s13 + $0x3b0] sm:$0xff]   ;;  %v3886_v53 = vld [vmem:[%s4939_s13 + $0x378] sm:$0xff]  }
 0x84c   : > { %3565 = vmatpush3.bf16.msra.mxu1 %v3840_v54  ;;  %v3887_v54 = vld [vmem:[%s4939_s13 + $0x3f8] sm:$0xff]  }
 0x84d   : > { %3587 = vmatpush3.bf16.msra.mxu0 %v3841_v57  ;;  %3566 = vmatprep.subr.bf16.mxu1 %v3842_v58  ;;  %v3888_v57 = vld [vmem:[%s4939_s13 + $0x338] sm:$0xff]   ;;  %v1707_v58 = vmax.f32 %v4607_v1, 0.0  ;;  %v3321_v1 = vld [vmem:[%s4974_s17] ss:$0 sm:$0xff] }
 0x84e   : > { %3588 = vmatprep.subr.bf16.mxu0 %v3843_v59  ;;  %v3889_v59 = vld [vmem:[%s4939_s13 + $0x3b8] sm:$0xff]  }
 0x850   : > { %3567 = vmatpush3.bf16.msra.mxu1 %v3844_v60  ;;  %v1709_v60 = vmax.f32 %v4610_v3, 0.0 }
 0x851   : > { %3589 = vmatpush3.bf16.msra.mxu0 %v3845_v61  ;;  %3568 = vmatprep.subr.bf16.mxu1 %v3846_v63  ;;  %v1723_v61 = vpack.c.bf16 %v1707_v58, %v1707_v58 }
 0x852   : > { %3590 = vmatprep.subr.bf16.mxu0 %v3847_v0  ;;  %v1725_v63 = vpack.c.bf16 %v1709_v60, %v1709_v60 }
 0x854   : > { %3569 = vmatpush3.bf16.msra.mxu1 %v3848_v5 }
 0x855   : > { %3591 = vmatpush3.bf16.msra.mxu0 %v3849_v7  ;;  %3570 = vmatprep.subr.bf16.mxu1 %v3850_v8 }
 0x856   : > { %3592 = vmatprep.subr.bf16.mxu0 %v3851_v9 }
 0x858   : > { %3571 = vmatpush3.bf16.msra.mxu1 %v3852_v12 }
 0x859   : > { %3593 = vmatpush3.bf16.msra.mxu0 %v3853_v14  ;;  %3572 = vmatprep.subr.bf16.mxu1 %v3854_v55 }
 0x85a   : > { %3594 = vmatprep.subr.bf16.mxu0 %v3855_v23 }
 0x85c   : > { %3573 = vmatpush3.bf16.msra.mxu1 %v3856_v41 }
 0x85d   : > { %3595 = vmatpush3.bf16.msra.mxu0 %v3857_v16  ;;  %3602 = vmatprep.subr.bf16.mxu1 %v3858_v33 }
 0x85e   : > { %3624 = vmatprep.subr.bf16.mxu0 %v3859_v4 }
 0x85f   : > { %2951 = vmatmul.mubr.bf16.vlgmr.msra.gmra.mrb[24].mxu1 %v1719_v19 }
 0x860   : > { %2991 = vmatmul.mubr.bf16.vlgmr.msra.gmra.mrb[28].mxu0 %v1721_v43  ;;  %3603 = vmatpush3.bf16.msra.mxu1 %v3860_v18 }
 0x861   : > { %3030 = vmatprep.mubr.bf16.mxu1 %v1724_v20  ;;  %3625 = vmatpush3.bf16.msra.mxu0 %v3861_v39 }
 0x862   : > { %3070 = vmatprep.mubr.bf16.mxu0 %v1726_v10  ;;  %3604 = vmatprep.subr.bf16.mxu1 %v3862_v40 }
 0x863   : > { %3626 = vmatprep.subr.bf16.mxu0 %v3863_v21 }
 0x864   : > { %3605 = vmatpush3.bf16.msra.mxu1 %v3864_v11 }
 0x865   : > { %3627 = vmatpush3.bf16.msra.mxu0 %v3865_v22  ;;  %3606 = vmatprep.subr.bf16.mxu1 %v3866_v2 }
 0x866   : > { %3628 = vmatprep.subr.bf16.mxu0 %v3867_v25 }
 0x868   : > { %3607 = vmatpush3.bf16.msra.mxu1 %v3868_v26 }
 0x869   : > { %3629 = vmatpush3.bf16.msra.mxu0 %v3869_v27  ;;  %3608 = vmatprep.subr.bf16.mxu1 %v3870_v28 }
 0x86a   : > { %3630 = vmatprep.subr.bf16.mxu0 %v3871_v29 }
 0x86c   : > { %3609 = vmatpush3.bf16.msra.mxu1 %v3872_v30 }
 0x86d   : > { %3631 = vmatpush3.bf16.msra.mxu0 %v3873_v31  ;;  %3610 = vmatprep.subr.bf16.mxu1 %v3874_v32 }
 0x86e   : > { %3632 = vmatprep.subr.bf16.mxu0 %v3875_v37 }
 0x870   : > { %3611 = vmatpush3.bf16.msra.mxu1 %v3876_v42 }
 0x871   : > { %3633 = vmatpush3.bf16.msra.mxu0 %v3877_v44  ;;  %3612 = vmatprep.subr.bf16.mxu1 %v3878_v45 }
 0x872   : > { %3634 = vmatprep.subr.bf16.mxu0 %v3879_v46 }
 0x874   : > { %3613 = vmatpush3.bf16.msra.mxu1 %v3880_v47 }
 0x875   : > { %3635 = vmatpush3.bf16.msra.mxu0 %v3881_v48  ;;  %3614 = vmatprep.subr.bf16.mxu1 %v3882_v49 }
 0x876   : > { %3636 = vmatprep.subr.bf16.mxu0 %v3883_v50 }
 0x878   : > { %3615 = vmatpush3.bf16.msra.mxu1 %v3884_v51 }
 0x879   : > { %3637 = vmatpush3.bf16.msra.mxu0 %v3885_v52  ;;  %3616 = vmatprep.subr.bf16.mxu1 %v3886_v53 }
 0x87a   : > { %3638 = vmatprep.subr.bf16.mxu0 %v3887_v54 }
 0x87c   : > { %3617 = vmatpush3.bf16.msra.mxu1 %v3888_v57 }
 0x87d   : > { %3639 = vmatpush3.bf16.msra.mxu0 %v3889_v59 }
 0x87f   : > { %3031 = vmatmul.mubr.bf16.vlgmr.msra.gmra.mrb[28].mxu1 %v1723_v61 }
 0x880   : > { %3071 = vmatmul.mubr.bf16.vlgmr.msra.gmra.mrb[32].mxu0 %v1725_v63 }
 0x8f2   : > { %v3486_v0 = vpop.f32.mrb[16].mxu1  ;;  %v3508_v5 = vpop.f32.mrb[20].mxu0 }
 0x8f3   : > { %v3487_v6 = vpop.f32.mrb[17].mxu1  ;;  %v3509_v7 = vpop.f32.mrb[21].mxu0 }
 0x8f4   : > { %v3488_v8 = vadd.f32 %v3487_v6, %v3486_v0  ;;  %v3510_v9 = vadd.f32 %v3509_v7, %v3508_v5  ;;  %v3489_v36 = vpop.f32.mrb[18].mxu1  ;;  %v3511_v24 = vpop.f32.mrb[22].mxu0 }
 0x8f5   : > { %v3490_v3 = vpop.f32.mrb[19].mxu1  ;;  %v3512_v12 = vpop.f32.mrb[23].mxu0 }
 0x8f6   : > { %v2793_v13 = vadd.f32 %v3488_v8, %v3321_v1 }
 0x8f8   : > { %v2833_v14 = vadd.f32 %v3510_v9, %v2793_v13 }
 0x912   : > { %v3530_v55 = vpop.f32.mrb[20].mxu1  ;;  %v3552_v23 = vpop.f32.mrb[24].mxu0 }
 0x913   : > { %v3531_v35 = vpop.f32.mrb[21].mxu1  ;;  %v3553_v56 = vpop.f32.mrb[25].mxu0 }
 0x914   : > { %v3532_v41 = vadd.f32 %v3531_v35, %v3530_v55  ;;  %v3554_v15 = vadd.f32 %v3553_v56, %v3552_v23  ;;  %v3533_v16 = vpop.f32.mrb[22].mxu1  ;;  %v3555_v33 = vpop.f32.mrb[26].mxu0 }
 0x915   : > { %v3534_v62 = vpop.f32.mrb[23].mxu1  ;;  %v3556_v4 = vpop.f32.mrb[27].mxu0 }
 0x916   : > { %v2873_v38 = vadd.f32 %v3532_v41, %v2833_v14 }
 0x918   : > { %v2913_v17 = vadd.f32 %v3554_v15, %v2873_v38 }
 0x932   : > { %v3574_v18 = vpop.f32.mrb[24].mxu1 }
 0x933   : > { %v3596_v19 = vpop.f32.mrb[28].mxu0  ;;  %v3575_v39 = vpop.f32.mrb[25].mxu1 }
 0x934   : > { %v3576_v43 = vadd.f32 %v3575_v39, %v3574_v18  ;;  %v3597_v40 = vpop.f32.mrb[29].mxu0  ;;  %v3577_v20 = vpop.f32.mrb[26].mxu1 }
 0x935   : > { %v3598_v21 = vadd.f32 %v3597_v40, %v3596_v19  ;;  %v3599_v10 = vpop.f32.mrb[30].mxu0  ;;  %v3578_v11 = vpop.f32.mrb[27].mxu1 }
 0x936   : > { %v2953_v22 = vadd.f32 %v3576_v43, %v2913_v17  ;;  %v3600_v2 = vpop.f32.mrb[31].mxu0 }
 0x938   : > { %v2993_v25 = vadd.f32 %v3598_v21, %v2953_v22 }
 0x952   : > { %v3618_v26 = vpop.f32.mrb[28].mxu1 }
 0x953   : > { %v3640_v27 = vpop.f32.mrb[32].mxu0  ;;  %v3619_v28 = vpop.f32.mrb[29].mxu1 }
 0x954   : > { %v3620_v29 = vadd.f32 %v3619_v28, %v3618_v26  ;;  %v3641_v30 = vpop.f32.mrb[33].mxu0  ;;  %v3621_v31 = vpop.f32.mrb[30].mxu1 }
 0x955   : > { %v3642_v32 = vadd.f32 %v3641_v30, %v3640_v27  ;;  %v3643_v37 = vpop.f32.mrb[34].mxu0  ;;  %v3622_v42 = vpop.f32.mrb[31].mxu1 }
 0x956   : > { %v3033_v44 = vadd.f32 %v3620_v29, %v2993_v25  ;;  %v3644_v45 = vpop.f32.mrb[35].mxu0 }
 0x958   : > { %v3073_v46 = vadd.f32 %v3642_v32, %v3033_v44 }
 0x95a   : > { %v3078_v47 = vadd.f32 %v3073_v46, %v4266_v34 }
 0x95c   : > { %3079 = vst.msk [vmem:[%s600_s15] sm:$0xff] %vm680_vm3, %v3078_v47 }
 0x95d   : > { %3915 = shalt.err (!%p3912_p6)
}
 0x95e   : > { %s3916_s25 = scalar_lea.hbm %s4874_s7, 128  ;;  %s3920_s29 = scalar_lea.hbm %s4978_s26, 256 }
 0x95f   : > { %p3917_p7 = scmp.ne.s32.totalorder %s4874_s7, %s3916_s25  ;;  %p3921_p11 = scmp.lt.u32.totalorder %s4874_s7, %s4978_s26 }
 0x960   : > { %p3922_p12 = scmp.lt.u32.totalorder %s3920_s29, %s3916_s25  ;;  %p3924_p0 = scmp.lt.u32.totalorder %s3916_s25, %s4874_s7 }
 0x961   : > { %p3918_p9 = pnand %p3917_p7, %p4124_p4 }
 0x962   : > { %p3923_p13 = por %p3922_p12, %p3921_p11 }
 0x963   : > { %p3919_p10 = pneg %p3918_p9 }
 0x964   : > { %p3925_p1 = por %p3924_p0, %p3923_p13 }
 0x966   : > { %p3926_p2 = pnand %p3925_p1, %p3919_p10 }
 0x968   : > { %3929 = shalt.err (!%p3926_p2)
}
 0x969   : > { %3674 = dma.vmem_to_hbm [thread:$0]  (%p4124_p4), %s4876_s21, 128, %s4874_s7, %s3081_s14  }
 0x96a PF: > { %s4980_s22 = sld [smem:[#allocation15_spill]]  ;;  %s4981_s23 = sld [smem:[#allocation10_spill]] }
 0x970   : > { %p3680_p3 = scmp.ge.s32.totalorder %s4980_s22, 2  ;;  %s3107_s19 = sand.u32 1, %s4981_s23  }
 0x971   : > { %s3108_s20 = scalar_lea.sflag [#allocation8], %s3107_s19 }
 0x972   : > { %p3677_p5 = pnand %p3680_p3, %p4131_p8 }
 0x974   : > { %3959 = dma.done.wait (!%p3677_p5), %s3108_s20, 128  }
 0x975   : > { %3961 = vsyncadd (!%p3677_p5), %s3108_s20, 4294967168  ;;  %s28_s23 = sadd.s32 1, %s4980_s22   ;;  %s4983_s18 = sld [smem:[#allocation11_spill]] }
 0x976   : > { %p25_p6 = scmp.ge.s32.totalorder %s28_s23, 4   ;;  %s4984_s19 = sld [smem:[#allocation12_spill]] }
 0x977   : > { %s4985_s20 = sld [smem:[#allocation19_spill]]  ;;  %s4986_s21 = sld [smem:[#allocation14_spill]] }
 0x978   : > { %s4987_s22 = sld [smem:[#allocation16_spill]]  ;;  %27 = sbr.rel (!%p25_p6) target bundleno = 9 (0x9), region = 168 }
 0x97f   :  { %3113 = vsyncpa [#allocation8], 1 }
 0x980   :  { %3115 = vsyncpa [#allocation8 + $0x1], 1 }

</bundles_post_ra>
